<compile_context>
chip_gen: v7x
topology: tpu7x:2x2x1
jax: 0.10.0
libtpu: 0.0.40
codegen_flags: <defaults>
</compile_context>

<pallas_src>
import functools

import jax
import jax.numpy as jnp
from jax.experimental import pallas as pl
from jax.experimental.pallas import tpu as pltpu

_VMEM_LIMIT = 32 * 1024 * 1024  # explicit scoped-VMEM cap; safe on v5e/v6e/v7x


# ------------------------------ small helpers ------------------------------ #

def _round_up(x, m):
    return (x + m - 1) // m * m


def _pad2d(a, shape):
    return jnp.pad(a, [(0, t - s) for s, t in zip(a.shape, shape)])


def _pick_tile(dim, cap):
    """Largest power-of-two-scaled tile <= cap that divides dim."""
    t = cap
    while dim % t:
        t //= 2
    return t


# ----------------------------- Pallas kernels ------------------------------ #

def _mm_bias_kernel(x_ref, w_ref, b_ref, o_ref, acc_ref, *, relu):
    """o = act(x @ w + b), K-tiled accumulation in a resident f32 scratch."""
    k = pl.program_id(2)

    @pl.when(k == 0)
    def _init():
        acc_ref[...] = jnp.zeros_like(acc_ref)

    acc_ref[...] += jnp.dot(x_ref[...], w_ref[...],
                            preferred_element_type=jnp.float32)

    @pl.when(k == pl.num_programs(2) - 1)
    def _finalize():
        r = acc_ref[...] + b_ref[...]
        if relu:
            r = jnp.maximum(r, 0.0)
        o_ref[...] = r.astype(o_ref.dtype)


def _mm_bias_shortcut_kernel(x_ref, w_ref, s_ref, ws_ref, b_ref, o_ref, acc_ref):
    """o = relu(x @ w + s @ ws + b) — conv3 with the shortcut conv fused in."""
    k = pl.program_id(2)

    @pl.when(k == 0)
    def _init():
        acc_ref[...] = jnp.dot(s_ref[...], ws_ref[...],
                               preferred_element_type=jnp.float32)

    acc_ref[...] += jnp.dot(x_ref[...], w_ref[...],
                            preferred_element_type=jnp.float32)

    @pl.when(k == pl.num_programs(2) - 1)
    def _finalize():
        o_ref[...] = jnp.maximum(acc_ref[...] + b_ref[...], 0.0).astype(o_ref.dtype)


def _mm_bias_residual_kernel(x_ref, w_ref, r_ref, b_ref, o_ref, acc_ref):
    """o = relu(x @ w + b + residual) — identity-shortcut variant (residual in f32)."""
    k = pl.program_id(2)

    @pl.when(k == 0)
    def _init():
        acc_ref[...] = r_ref[...].astype(jnp.float32)

    acc_ref[...] += jnp.dot(x_ref[...], w_ref[...],
                            preferred_element_type=jnp.float32)

    @pl.when(k == pl.num_programs(2) - 1)
    def _finalize():
        o_ref[...] = jnp.maximum(acc_ref[...] + b_ref[...], 0.0).astype(o_ref.dtype)


def _conv3x3_kernel(x_ref, w_ref, b_ref, o_ref, *, stride, wrow, rows_out):
    """3x3 conv (pad=1, stride s) + bias + ReLU as 9 accumulated MXU matmuls.

    x_ref: (s*s, rows_alloc, Cin_pad) bf16 — spatially flattened, phase-split, zero padded
    w_ref: (3, 3, Cin_pad, tn)        bf16
    b_ref: (1, tn) f32
    o_ref: (1, rows_out, tn) — rows_out = Ho * Wph (junk columns are sliced off in glue)
    """
    cout = o_ref.shape[-1]
    acc = jnp.zeros((rows_out, cout), jnp.float32)
    for dy in range(3):
        for dx in range(3):
            phase = (dy % stride) * stride + (dx % stride)
            off = (dy // stride) * wrow + (dx // stride)
            win = x_ref[phase, pl.ds(off, rows_out), :]          # (rows_out, Cin_pad)
            acc += jnp.dot(win, w_ref[dy, dx],
                           preferred_element_type=jnp.float32)
    acc = jnp.maximum(acc + b_ref[...], 0.0)
    o_ref[0] = acc.astype(o_ref.dtype)


# ------------------------------ kernel wrappers ----------------------------- #

def matmul_bias(x, w, b, *, relu=False, shortcut=None, residual=None,
                out_dtype=jnp.float32):
    """Tiled act(x @ w + b [+ s @ ws | + residual]). x/w (and shortcut) are bf16."""
    M, K = x.shape
    K2, N = w.shape
    assert K == K2 and M % 8 == 0 and K % 128 == 0 and N % 128 == 0

    tm = _pick_tile(M, 512)
    tn = _pick_tile(N, 256)
    tk = _pick_tile(K, 512)
    grid = (M // tm, N // tn, K // tk)

    x_spec = pl.BlockSpec((tm, tk), lambda i, j, k: (i, k))
    w_spec = pl.BlockSpec((tk, tn), lambda i, j, k: (k, j))
    b_spec = pl.BlockSpec((1, tn), lambda i, j, k: (0, j))
    o_spec = pl.BlockSpec((tm, tn), lambda i, j, k: (i, j))

    flops = 2 * M * K * N
    bytes_accessed = (x.size * x.dtype.itemsize + w.size * w.dtype.itemsize
                      + b.size * 4 + M * N * jnp.dtype(out_dtype).itemsize)

    if shortcut is not None:
        s, ws = shortcut
        Ks = s.shape[1]
        kernel = _mm_bias_shortcut_kernel
        in_specs = [x_spec, w_spec,
                    pl.BlockSpec((tm, Ks), lambda i, j, k: (i, 0)),
                    pl.BlockSpec((Ks, tn), lambda i, j, k: (0, j)),
                    b_spec]
        args = (x, w, s, ws, b)
        flops += 2 * M * Ks * N
        bytes_accessed += s.size * s.dtype.itemsize + ws.size * ws.dtype.itemsize
    elif residual is not None:
        kernel = _mm_bias_residual_kernel
        in_specs = [x_spec, w_spec,
                    pl.BlockSpec((tm, tn), lambda i, j, k: (i, j)),
                    b_spec]
        args = (x, w, residual, b)
        bytes_accessed += residual.size * residual.dtype.itemsize
    else:
        kernel = functools.partial(_mm_bias_kernel, relu=relu)
        in_specs = [x_spec, w_spec, b_spec]
        args = (x, w, b)

    return pl.pallas_call(
        kernel,
        out_shape=jax.ShapeDtypeStruct((M, N), out_dtype),
        grid=grid,
        in_specs=in_specs,
        out_specs=o_spec,
        scratch_shapes=[pltpu.VMEM((tm, tn), jnp.float32)],
        compiler_params=pltpu.CompilerParams(
            dimension_semantics=("parallel", "parallel", "arbitrary"),
            vmem_limit_bytes=_VMEM_LIMIT),
        cost_estimate=pl.CostEstimate(flops=int(flops), transcendentals=0,
                                      bytes_accessed=int(bytes_accessed)),
    )(*args)


def conv3x3_bn_relu(flat_phases, w2, b2, *, stride, wrow, rows_out,
                    out_dtype=jnp.bfloat16):
    """3x3+pad1+stride conv from flattened phase-split input (no HBM im2col)."""
    n_phase, rows_in, cin = flat_phases.shape
    n_img = n_phase // (stride * stride)
    cout = w2.shape[-1]
    tn = _pick_tile(cout, 256)
    grid = (n_img, cout // tn)

    kernel = functools.partial(_conv3x3_kernel, stride=stride,
                               wrow=wrow, rows_out=rows_out)
    flops = 2 * n_img * rows_out * 9 * cin * cout
    bytes_accessed = (flat_phases.size * flat_phases.dtype.itemsize
                      + w2.size * w2.dtype.itemsize + b2.size * 4
                      + n_img * rows_out * cout * jnp.dtype(out_dtype).itemsize)

    return pl.pallas_call(
        kernel,
        out_shape=jax.ShapeDtypeStruct((n_img, rows_out, cout), out_dtype),
        grid=grid,
        in_specs=[
            pl.BlockSpec((stride * stride, rows_in, cin), lambda n, j: (n, 0, 0)),
            pl.BlockSpec((3, 3, cin, tn), lambda n, j: (0, 0, 0, j)),
            pl.BlockSpec((1, tn), lambda n, j: (0, j)),
        ],
        out_specs=pl.BlockSpec((1, rows_out, tn), lambda n, j: (n, 0, j)),
        compiler_params=pltpu.CompilerParams(
            dimension_semantics=("parallel", "parallel"),
            vmem_limit_bytes=_VMEM_LIMIT),
        cost_estimate=pl.CostEstimate(flops=int(flops), transcendentals=0,
                                      bytes_accessed=int(bytes_accessed)),
    )(flat_phases, w2, b2)


# ------------------------------- JAX glue ---------------------------------- #

def _phase_flatten(x_nhwc, stride):
    """Zero-pad (for 3x3, pad=1), split into stride x stride phases and flatten
    spatially so every conv tap becomes a constant row offset inside the kernel."""
    N, H, W, C = x_nhwc.shape
    s = stride
    xp = jnp.pad(x_nhwc, ((0, 0), (1, 1), (1, 1), (0, 0)))
    Hp, Wp = H + 2, W + 2
    Hps, Wps = _round_up(Hp, s), _round_up(Wp, s)
    xp = jnp.pad(xp, ((0, 0), (0, Hps - Hp), (0, Wps - Wp), (0, 0)))
    Hph, Wph = Hps // s, Wps // s
    ph = xp.reshape(N, Hph, s, Wph, s, C).transpose(0, 2, 4, 1, 3, 5)
    flat = ph.reshape(N * s * s, Hph * Wph, C)
    Ho = (H + 2 - 3) // s + 1
    Wo = (W + 2 - 3) // s + 1
    rows_out = Ho * Wph                      # includes (Wph - Wo) junk cols per row
    q = 2 // s
    rows_need = rows_out + q * (Wph + 1)     # max in-kernel read extent
    rows_alloc = _round_up(max(flat.shape[1], rows_need), 8)
    flat = jnp.pad(flat, ((0, 0), (0, rows_alloc - flat.shape[1]), (0, 0)))
    return flat, Ho, Wo, Wph, rows_out


def make_conv_bn_params(key, cin, cout, ksize):
    """Deterministic conv weight + BN params, folded into (HWIO weight, bias)."""
    kw, kg, kb, km, kv = jax.random.split(key, 5)
    w = jax.random.normal(kw, (cout, cin, ksize, ksize), jnp.float32) * 0.1   # OIHW
    gamma = 1.0 + 0.1 * jax.random.normal(kg, (cout,), jnp.float32)
    beta = 0.1 * jax.random.normal(kb, (cout,), jnp.float32)
    mean = 0.1 * jax.random.normal(km, (cout,), jnp.float32)
    var = jnp.abs(jax.random.normal(kv, (cout,), jnp.float32)) * 0.1 + 0.5
    eps = 1e-5
    scale = gamma / jnp.sqrt(var + eps)
    w_folded = w * scale[:, None, None, None]
    b_folded = beta - mean * scale
    w_hwio = jnp.transpose(w_folded, (2, 3, 1, 0))     # (kh, kw, cin, cout)
    return w_hwio, b_folded


def make_bottleneck_params(key, in_planes, planes, stride, expansion=4):
    k1, k2, k3, ks = jax.random.split(key, 4)
    params = {
        "conv1": make_conv_bn_params(k1, in_planes, planes, 1),
        "conv2": make_conv_bn_params(k2, planes, planes, 3),
        "conv3": make_conv_bn_params(k3, planes, expansion * planes, 1),
    }
    if stride != 1 or in_planes != expansion * planes:
        params["shortcut"] = make_conv_bn_params(ks, in_planes, expansion * planes, 1)
    return params
    # TODO(synk): OREPA's training-time multi-branch over-parameterization is not
    # reproduced; each block is the inference-equivalent folded conv+BN.


def bottleneck_forward(x_nchw, params, stride):
    """Pallas-backed forward matching Bottleneck.forward (input/output NCHW)."""
    x = jnp.transpose(x_nchw, (0, 2, 3, 1)).astype(jnp.float32)   # -> NHWC
    N, H, W, Cin = x.shape

    w1, b1 = params["conv1"]
    w2, b2 = params["conv2"]
    w3, b3 = params["conv3"]
    c1, c2, c3 = w1.shape[-1], w2.shape[-1], w3.shape[-1]

    # channel padding to multiples of 128 -> lane-dense, MXU-aligned tiles
    Cinp = _round_up(Cin, 128)
    C1p = _round_up(c1, 128)
    C2p = _round_up(c2, 128)
    C3p = _round_up(c3, 128)

    # ---- conv1: 1x1 + BN + ReLU (tiled MXU matmul, bf16 inputs, f32 accumulate) ----
    # TODO(synk): fuse conv1 into the conv2 kernel so out1 never round-trips HBM.
    M1 = N * H * W
    Mp1 = _round_up(M1, 8)
    x2d = _pad2d(x.reshape(M1, Cin), (Mp1, Cinp)).astype(jnp.bfloat16)
    w1m = _pad2d(w1.reshape(Cin, c1), (Cinp, C1p)).astype(jnp.bfloat16)
    b1p = _pad2d(b1.reshape(1, c1), (1, C1p))
    out1 = matmul_bias(x2d, w1m, b1p, relu=True, out_dtype=jnp.bfloat16)
    out1 = out1[:M1].reshape(N, H, W, C1p)

    # ---- conv2: 3x3, pad=1, stride + BN + ReLU — in-kernel 9-tap accumulation ----
    flat, Ho, Wo, Wph, rows_out = _phase_flatten(out1, stride)
    w2p = jnp.pad(w2, ((0, 0), (0, 0), (0, C1p - c1), (0, C2p - c2))).astype(jnp.bfloat16)
    b2p = _pad2d(b2.reshape(1, c2), (1, C2p))
    out2 = conv3x3_bn_relu(flat, w2p, b2p, stride=stride, wrow=Wph,
                           rows_out=rows_out, out_dtype=jnp.bfloat16)
    out2 = out2.reshape(N, Ho, Wph, C2p)[:, :, :Wo, :]            # drop junk columns

    # ---- conv3 (1x1 + BN) fused with shortcut + final ReLU ----
    M3 = N * Ho * Wo
    Mp3 = _round_up(M3, 8)
    out2_2d = _pad2d(out2.reshape(M3, C2p), (Mp3, C2p))
    w3m = _pad2d(w3.reshape(c2, c3), (C2p, C3p)).astype(jnp.bfloat16)

    if "shortcut" in params:
        ws, bs = params["shortcut"]
        # TODO(synk): fold the stride into the shortcut BlockSpec index_map instead of
        # this XLA strided-slice copy.
        xs = x[:, ::stride, ::stride, :]
        xs2d = _pad2d(xs.reshape(M3, Cin), (Mp3, Cinp)).astype(jnp.bfloat16)
        wsm = _pad2d(ws.reshape(Cin, c3), (Cinp, C3p)).astype(jnp.bfloat16)
        bcomb = _pad2d((b3 + bs).reshape(1, c3), (1, C3p))
        out = matmul_bias(out2_2d, w3m, bcomb, shortcut=(xs2d, wsm),
                          out_dtype=jnp.float32)
    else:
        # identity shortcut (stride == 1 and Cin == expansion*planes)
        b3p = _pad2d(b3.reshape(1, c3), (1, C3p))
        res = _pad2d(x.reshape(M1, Cin), (Mp3, C3p))              # f32 residual
        out = matmul_bias(out2_2d, w3m, b3p, residual=res, out_dtype=jnp.float32)

    out = out[:M3, :c3].reshape(N, Ho, Wo, c3)
    return jnp.transpose(out, (0, 3, 1, 2))                       # -> NCHW


# --------------------------- pure-JAX reference ----------------------------- #

def reference_forward(x_nchw, params, stride):
    x = jnp.transpose(x_nchw, (0, 2, 3, 1)).astype(jnp.float32)

    def conv(inp, w_hwio, b, s, pad):
        y = jax.lax.conv_general_dilated(
            inp, w_hwio, (s, s), [(pad, pad), (pad, pad)],
            dimension_numbers=("NHWC", "HWIO", "NHWC"))
        return y + b

    o = jax.nn.relu(conv(x, *params["conv1"], 1, 0))
    o = jax.nn.relu(conv(o, *params["conv2"], stride, 1))
    o = conv(o, *params["conv3"], 1, 0)
    s = conv(x, *params["shortcut"], stride, 0) if "shortcut" in params else x
    return jnp.transpose(jax.nn.relu(o + s), (0, 3, 1, 2))


# ---------------------------------- main ------------------------------------ #

if __name__ == "__main__":
    key = jax.random.PRNGKey(0)
    kx, kp = jax.random.split(key)

    batch, in_planes, planes, spatial, stride = 2, 8, 4, 8, 2
    x = jax.random.normal(kx, (batch, in_planes, spatial, spatial), jnp.float32)  # NCHW

    params = make_bottleneck_params(kp, in_planes, planes, stride)

    forward = jax.jit(bottleneck_forward, static_argnames=("stride",))
    out = jax.block_until_ready(forward(x, params, stride=stride))

    ref = jax.block_until_ready(reference_forward(x, params, stride))
    assert out.shape == ref.shape == (batch, 4 * planes, spatial // stride, spatial // stride)
    assert jnp.allclose(out, ref, atol=1e-2, rtol=1e-2), "Pallas output mismatch vs reference"

    print("KERNEL_OK")
</pallas_src>

<mosaic_0001>
module attributes {stable_mosaic.version = 11 : i64} {
  func.func @_mm_bias_kernel(%arg0: i32, %arg1: i32, %arg2: i32, %arg3: memref<128x128xbf16, #tpu.memory_space<vmem>>, %arg4: memref<128x128xbf16, #tpu.memory_space<vmem>>, %arg5: memref<1x128xf32, #tpu.memory_space<vmem>>, %arg6: memref<128x128xbf16, #tpu.memory_space<vmem>>, %arg7: memref<128x128xf32, #tpu.memory_space<vmem>>) attributes {dimension_semantics = [#tpu.dimension_semantics<parallel>, #tpu.dimension_semantics<parallel>, #tpu.dimension_semantics<arbitrary>], iteration_bounds = array<i64: 1, 1, 1>, scalar_prefetch = 0 : i64, scratch_operands = 1 : i64, tpu.core_type = #tpu.core_type<tc>, window_params = [{transform_indices = @transform_0, window_bounds = array<i64: 128, 128>}, {transform_indices = @transform_1, window_bounds = array<i64: 128, 128>}, {transform_indices = @transform_2, window_bounds = array<i64: 1, 128>}, {transform_indices = @transform_3, window_bounds = array<i64: 128, 128>}]} {
    %c0_i32 = arith.constant 0 : i32
    %0 = arith.cmpi eq, %arg2, %c0_i32 : i32
    %1 = arith.extui %0 : i1 to i32
    %c0_i32_0 = arith.constant 0 : i32
    %2 = arith.cmpi ne, %1, %c0_i32_0 : i32
    scf.if %2 {
      %cst_10 = arith.constant 0.000000e+00 : f32
      %12 = vector.broadcast %cst_10 : f32 to vector<128x128xf32>
      %c0_11 = arith.constant 0 : index
      %c0_12 = arith.constant 0 : index
      %13 = vector.load %arg7[%c0_11, %c0_12] : memref<128x128xf32, #tpu.memory_space<vmem>>, vector<128x128xf32>
      tpu.vector_store %arg7[%c0_11, %c0_12], %12 {strides = array<i32>} : memref<128x128xf32, #tpu.memory_space<vmem>>, vector<128x128xf32>,
    } else {
    }
    %c0 = arith.constant 0 : index
    %c0_1 = arith.constant 0 : index
    %3 = vector.load %arg7[%c0, %c0_1] : memref<128x128xf32, #tpu.memory_space<vmem>>, vector<128x128xf32>
    %c0_2 = arith.constant 0 : index
    %c0_3 = arith.constant 0 : index
    %4 = vector.load %arg3[%c0_2, %c0_3] : memref<128x128xbf16, #tpu.memory_space<vmem>>, vector<128x128xbf16>
    %c0_4 = arith.constant 0 : index
    %c0_5 = arith.constant 0 : index
    %5 = vector.load %arg4[%c0_4, %c0_5] : memref<128x128xbf16, #tpu.memory_space<vmem>>, vector<128x128xbf16>
    %cst = arith.constant dense<0.000000e+00> : vector<128x128xf32>
    %6 = tpu.matmul %4, %5, %cst {dimension_numbers = #tpu.dot_dimension_numbers<[1], [0], [0], [1], [0, 0, 1, 1], [], []>} : vector<128x128xbf16>, vector<128x128xbf16>, vector<128x128xf32> -> vector<128x128xf32>
    %7 = arith.addf %3, %6 : vector<128x128xf32>
    %c0_6 = arith.constant 0 : index
    %c0_7 = arith.constant 0 : index
    %8 = vector.load %arg7[%c0_6, %c0_7] : memref<128x128xf32, #tpu.memory_space<vmem>>, vector<128x128xf32>
    tpu.vector_store %arg7[%c0_6, %c0_7], %7 {strides = array<i32>} : memref<128x128xf32, #tpu.memory_space<vmem>>, vector<128x128xf32>,
    %c0_i32_8 = arith.constant 0 : i32
    %9 = arith.cmpi eq, %arg2, %c0_i32_8 : i32
    %10 = arith.extui %9 : i1 to i32
    %c0_i32_9 = arith.constant 0 : i32
    %11 = arith.cmpi ne, %10, %c0_i32_9 : i32
    scf.if %11 {
      %c0_10 = arith.constant 0 : index
      %c0_11 = arith.constant 0 : index
      %12 = vector.load %arg7[%c0_10, %c0_11] : memref<128x128xf32, #tpu.memory_space<vmem>>, vector<128x128xf32>
      %c0_12 = arith.constant 0 : index
      %c0_13 = arith.constant 0 : index
      %13 = vector.load %arg5[%c0_12, %c0_13] : memref<1x128xf32, #tpu.memory_space<vmem>>, vector<1x128xf32>
      %14 = vector.broadcast %13 : vector<1x128xf32> to vector<128x128xf32>
      %15 = arith.addf %12, %14 : vector<128x128xf32>
      %cst_14 = arith.constant 0.000000e+00 : f32
      %16 = vector.broadcast %cst_14 : f32 to vector<128x128xf32>
      %17 = arith.maximumf %15, %16 : vector<128x128xf32>
      %18 = arith.truncf %17 : vector<128x128xf32> to vector<128x128xbf16>
      %c0_15 = arith.constant 0 : index
      %c0_16 = arith.constant 0 : index
      %19 = vector.load %arg6[%c0_15, %c0_16] : memref<128x128xbf16, #tpu.memory_space<vmem>>, vector<128x128xbf16>
      tpu.vector_store %arg6[%c0_15, %c0_16], %18 {strides = array<i32>} : memref<128x128xbf16, #tpu.memory_space<vmem>>, vector<128x128xbf16>,
    } else {
    }
    return
  }
  func.func @transform_0(%arg0: i32, %arg1: i32, %arg2: i32) -> (i32, i32) {
    %c0_i32 = arith.constant 0 : i32
    return %arg0, %arg2 : i32, i32
  }
  func.func @transform_1(%arg0: i32, %arg1: i32, %arg2: i32) -> (i32, i32) {
    %c0_i32 = arith.constant 0 : i32
    return %arg2, %arg1 : i32, i32
  }
  func.func @transform_2(%arg0: i32, %arg1: i32, %arg2: i32) -> (i32, i32) {
    %c0_i32 = arith.constant 0 : i32
    %c0_i32_0 = arith.constant 0 : i32
    return %c0_i32, %arg1 : i32, i32
  }
  func.func @transform_3(%arg0: i32, %arg1: i32, %arg2: i32) -> (i32, i32) {
    %c0_i32 = arith.constant 0 : i32
    return %arg0, %arg1 : i32, i32
  }
}

module attributes {stable_mosaic.version = 11 : i64} {
  func.func @_conv3x3_kernel(%arg0: i32, %arg1: i32, %arg2: memref<4x32x128xbf16, #tpu.memory_space<vmem>>, %arg3: memref<3x3x128x128xbf16, #tpu.memory_space<vmem>>, %arg4: memref<1x128xf32, #tpu.memory_space<vmem>>, %arg5: memref<1x20x128xbf16, #tpu.memory_space<vmem>>) attributes {dimension_semantics = [#tpu.dimension_semantics<parallel>, #tpu.dimension_semantics<parallel>], iteration_bounds = array<i64: 2, 1>, scalar_prefetch = 0 : i64, scratch_operands = 0 : i64, tpu.core_type = #tpu.core_type<tc>, window_params = [{transform_indices = @transform_0, window_bounds = array<i64: 4, 32, 128>}, {transform_indices = @transform_1, window_bounds = array<i64: 3, 3, 128, 128>}, {transform_indices = @transform_2, window_bounds = array<i64: 1, 128>}, {transform_indices = @transform_3, window_bounds = array<i64: 1, 20, 128>}]} {
    %cst = arith.constant 0.000000e+00 : f32
    %0 = vector.broadcast %cst : f32 to vector<20x128xf32>
    %c0 = arith.constant 0 : index
    %c0_0 = arith.constant 0 : index
    %c0_1 = arith.constant 0 : index
    %1 = vector.load %arg2[%c0, %c0_0, %c0_1] : memref<4x32x128xbf16, #tpu.memory_space<vmem>>, vector<1x20x128xbf16>
    %2 = vector.shape_cast %1 : vector<1x20x128xbf16> to vector<20x128xbf16>
    %c0_2 = arith.constant 0 : index
    %c0_3 = arith.constant 0 : index
    %c0_4 = arith.constant 0 : index
    %c0_5 = arith.constant 0 : index
    %3 = vector.load %arg3[%c0_2, %c0_3, %c0_4, %c0_5] : memref<3x3x128x128xbf16, #tpu.memory_space<vmem>>, vector<1x1x128x128xbf16>
    %4 = vector.shape_cast %3 : vector<1x1x128x128xbf16> to vector<128x128xbf16>
    %cst_6 = arith.constant dense<0.000000e+00> : vector<20x128xf32>
    %5 = tpu.matmul %2, %4, %cst_6 {dimension_numbers = #tpu.dot_dimension_numbers<[1], [0], [0], [1], [0, 0, 1, 1], [], []>} : vector<20x128xbf16>, vector<128x128xbf16>, vector<20x128xf32> -> vector<20x128xf32>
    %6 = arith.addf %0, %5 : vector<20x128xf32>
    %c1 = arith.constant 1 : index
    %c0_7 = arith.constant 0 : index
    %c0_8 = arith.constant 0 : index
    %7 = vector.load %arg2[%c1, %c0_7, %c0_8] : memref<4x32x128xbf16, #tpu.memory_space<vmem>>, vector<1x20x128xbf16>
    %8 = vector.shape_cast %7 : vector<1x20x128xbf16> to vector<20x128xbf16>
    %c0_9 = arith.constant 0 : index
    %c1_10 = arith.constant 1 : index
    %c0_11 = arith.constant 0 : index
    %c0_12 = arith.constant 0 : index
    %9 = vector.load %arg3[%c0_9, %c1_10, %c0_11, %c0_12] : memref<3x3x128x128xbf16, #tpu.memory_space<vmem>>, vector<1x1x128x128xbf16>
    %10 = vector.shape_cast %9 : vector<1x1x128x128xbf16> to vector<128x128xbf16>
    %cst_13 = arith.constant dense<0.000000e+00> : vector<20x128xf32>
    %11 = tpu.matmul %8, %10, %cst_13 {dimension_numbers = #tpu.dot_dimension_numbers<[1], [0], [0], [1], [0, 0, 1, 1], [], []>} : vector<20x128xbf16>, vector<128x128xbf16>, vector<20x128xf32> -> vector<20x128xf32>
    %12 = arith.addf %6, %11 : vector<20x128xf32>
    %c0_14 = arith.constant 0 : index
    %c1_15 = arith.constant 1 : index
    %c0_16 = arith.constant 0 : index
    %13 = vector.load %arg2[%c0_14, %c1_15, %c0_16] : memref<4x32x128xbf16, #tpu.memory_space<vmem>>, vector<1x20x128xbf16>
    %14 = vector.shape_cast %13 : vector<1x20x128xbf16> to vector<20x128xbf16>
    %c0_17 = arith.constant 0 : index
    %c2 = arith.constant 2 : index
    %c0_18 = arith.constant 0 : index
    %c0_19 = arith.constant 0 : index
    %15 = vector.load %arg3[%c0_17, %c2, %c0_18, %c0_19] : memref<3x3x128x128xbf16, #tpu.memory_space<vmem>>, vector<1x1x128x128xbf16>
    %16 = vector.shape_cast %15 : vector<1x1x128x128xbf16> to vector<128x128xbf16>
    %cst_20 = arith.constant dense<0.000000e+00> : vector<20x128xf32>
    %17 = tpu.matmul %14, %16, %cst_20 {dimension_numbers = #tpu.dot_dimension_numbers<[1], [0], [0], [1], [0, 0, 1, 1], [], []>} : vector<20x128xbf16>, vector<128x128xbf16>, vector<20x128xf32> -> vector<20x128xf32>
    %18 = arith.addf %12, %17 : vector<20x128xf32>
    %c2_21 = arith.constant 2 : index
    %c0_22 = arith.constant 0 : index
    %c0_23 = arith.constant 0 : index
    %19 = vector.load %arg2[%c2_21, %c0_22, %c0_23] : memref<4x32x128xbf16, #tpu.memory_space<vmem>>, vector<1x20x128xbf16>
    %20 = vector.shape_cast %19 : vector<1x20x128xbf16> to vector<20x128xbf16>
    %c1_24 = arith.constant 1 : index
    %c0_25 = arith.constant 0 : index
    %c0_26 = arith.constant 0 : index
    %c0_27 = arith.constant 0 : index
    %21 = vector.load %arg3[%c1_24, %c0_25, %c0_26, %c0_27] : memref<3x3x128x128xbf16, #tpu.memory_space<vmem>>, vector<1x1x128x128xbf16>
    %22 = vector.shape_cast %21 : vector<1x1x128x128xbf16> to vector<128x128xbf16>
    %cst_28 = arith.constant dense<0.000000e+00> : vector<20x128xf32>
    %23 = tpu.matmul %20, %22, %cst_28 {dimension_numbers = #tpu.dot_dimension_numbers<[1], [0], [0], [1], [0, 0, 1, 1], [], []>} : vector<20x128xbf16>, vector<128x128xbf16>, vector<20x128xf32> -> vector<20x128xf32>
    %24 = arith.addf %18, %23 : vector<20x128xf32>
    %c3 = arith.constant 3 : index
    %c0_29 = arith.constant 0 : index
    %c0_30 = arith.constant 0 : index
    %25 = vector.load %arg2[%c3, %c0_29, %c0_30] : memref<4x32x128xbf16, #tpu.memory_space<vmem>>, vector<1x20x128xbf16>
    %26 = vector.shape_cast %25 : vector<1x20x128xbf16> to vector<20x128xbf16>
    %c1_31 = arith.constant 1 : index
    %c1_32 = arith.constant 1 : index
    %c0_33 = arith.constant 0 : index
    %c0_34 = arith.constant 0 : index
    %27 = vector.load %arg3[%c1_31, %c1_32, %c0_33, %c0_34] : memref<3x3x128x128xbf16, #tpu.memory_space<vmem>>, vector<1x1x128x128xbf16>
    %28 = vector.shape_cast %27 : vector<1x1x128x128xbf16> to vector<128x128xbf16>
    %cst_35 = arith.constant dense<0.000000e+00> : vector<20x128xf32>
    %29 = tpu.matmul %26, %28, %cst_35 {dimension_numbers = #tpu.dot_dimension_numbers<[1], [0], [0], [1], [0, 0, 1, 1], [], []>} : vector<20x128xbf16>, vector<128x128xbf16>, vector<20x128xf32> -> vector<20x128xf32>
    %30 = arith.addf %24, %29 : vector<20x128xf32>
    %c2_36 = arith.constant 2 : index
    %c1_37 = arith.constant 1 : index
    %c0_38 = arith.constant 0 : index
    %31 = vector.load %arg2[%c2_36, %c1_37, %c0_38] : memref<4x32x128xbf16, #tpu.memory_space<vmem>>, vector<1x20x128xbf16>
    %32 = vector.shape_cast %31 : vector<1x20x128xbf16> to vector<20x128xbf16>
    %c1_39 = arith.constant 1 : index
    %c2_40 = arith.constant 2 : index
    %c0_41 = arith.constant 0 : index
    %c0_42 = arith.constant 0 : index
    %33 = vector.load %arg3[%c1_39, %c2_40, %c0_41, %c0_42] : memref<3x3x128x128xbf16, #tpu.memory_space<vmem>>, vector<1x1x128x128xbf16>
    %34 = vector.shape_cast %33 : vector<1x1x128x128xbf16> to vector<128x128xbf16>
    %cst_43 = arith.constant dense<0.000000e+00> : vector<20x128xf32>
    %35 = tpu.matmul %32, %34, %cst_43 {dimension_numbers = #tpu.dot_dimension_numbers<[1], [0], [0], [1], [0, 0, 1, 1], [], []>} : vector<20x128xbf16>, vector<128x128xbf16>, vector<20x128xf32> -> vector<20x128xf32>
    %36 = arith.addf %30, %35 : vector<20x128xf32>
    %c0_44 = arith.constant 0 : index
    %c5 = arith.constant 5 : index
    %c0_45 = arith.constant 0 : index
    %37 = vector.load %arg2[%c0_44, %c5, %c0_45] : memref<4x32x128xbf16, #tpu.memory_space<vmem>>, vector<1x20x128xbf16>
    %38 = vector.shape_cast %37 : vector<1x20x128xbf16> to vector<20x128xbf16>
    %c2_46 = arith.constant 2 : index
    %c0_47 = arith.constant 0 : index
    %c0_48 = arith.constant 0 : index
    %c0_49 = arith.constant 0 : index
    %39 = vector.load %arg3[%c2_46, %c0_47, %c0_48, %c0_49] : memref<3x3x128x128xbf16, #tpu.memory_space<vmem>>, vector<1x1x128x128xbf16>
    %40 = vector.shape_cast %39 : vector<1x1x128x128xbf16> to vector<128x128xbf16>
    %cst_50 = arith.constant dense<0.000000e+00> : vector<20x128xf32>
    %41 = tpu.matmul %38, %40, %cst_50 {dimension_numbers = #tpu.dot_dimension_numbers<[1], [0], [0], [1], [0, 0, 1, 1], [], []>} : vector<20x128xbf16>, vector<128x128xbf16>, vector<20x128xf32> -> vector<20x128xf32>
    %42 = arith.addf %36, %41 : vector<20x128xf32>
    %c1_51 = arith.constant 1 : index
    %c5_52 = arith.constant 5 : index
    %c0_53 = arith.constant 0 : index
    %43 = vector.load %arg2[%c1_51, %c5_52, %c0_53] : memref<4x32x128xbf16, #tpu.memory_space<vmem>>, vector<1x20x128xbf16>
    %44 = vector.shape_cast %43 : vector<1x20x128xbf16> to vector<20x128xbf16>
    %c2_54 = arith.constant 2 : index
    %c1_55 = arith.constant 1 : index
    %c0_56 = arith.constant 0 : index
    %c0_57 = arith.constant 0 : index
    %45 = vector.load %arg3[%c2_54, %c1_55, %c0_56, %c0_57] : memref<3x3x128x128xbf16, #tpu.memory_space<vmem>>, vector<1x1x128x128xbf16>
    %46 = vector.shape_cast %45 : vector<1x1x128x128xbf16> to vector<128x128xbf16>
    %cst_58 = arith.constant dense<0.000000e+00> : vector<20x128xf32>
    %47 = tpu.matmul %44, %46, %cst_58 {dimension_numbers = #tpu.dot_dimension_numbers<[1], [0], [0], [1], [0, 0, 1, 1], [], []>} : vector<20x128xbf16>, vector<128x128xbf16>, vector<20x128xf32> -> vector<20x128xf32>
    %48 = arith.addf %42, %47 : vector<20x128xf32>
    %c0_59 = arith.constant 0 : index
    %c6 = arith.constant 6 : index
    %c0_60 = arith.constant 0 : index
    %49 = vector.load %arg2[%c0_59, %c6, %c0_60] : memref<4x32x128xbf16, #tpu.memory_space<vmem>>, vector<1x20x128xbf16>
    %50 = vector.shape_cast %49 : vector<1x20x128xbf16> to vector<20x128xbf16>
    %c2_61 = arith.constant 2 : index
    %c2_62 = arith.constant 2 : index
    %c0_63 = arith.constant 0 : index
    %c0_64 = arith.constant 0 : index
    %51 = vector.load %arg3[%c2_61, %c2_62, %c0_63, %c0_64] : memref<3x3x128x128xbf16, #tpu.memory_space<vmem>>, vector<1x1x128x128xbf16>
    %52 = vector.shape_cast %51 : vector<1x1x128x128xbf16> to vector<128x128xbf16>
    %cst_65 = arith.constant dense<0.000000e+00> : vector<20x128xf32>
    %53 = tpu.matmul %50, %52, %cst_65 {dimension_numbers = #tpu.dot_dimension_numbers<[1], [0], [0], [1], [0, 0, 1, 1], [], []>} : vector<20x128xbf16>, vector<128x128xbf16>, vector<20x128xf32> -> vector<20x128xf32>
    %54 = arith.addf %48, %53 : vector<20x128xf32>
    %c0_66 = arith.constant 0 : index
    %c0_67 = arith.constant 0 : index
    %55 = vector.load %arg4[%c0_66, %c0_67] : memref<1x128xf32, #tpu.memory_space<vmem>>, vector<1x128xf32>
    %56 = vector.broadcast %55 : vector<1x128xf32> to vector<20x128xf32>
    %57 = arith.addf %54, %56 : vector<20x128xf32>
    %cst_68 = arith.constant 0.000000e+00 : f32
    %58 = vector.broadcast %cst_68 : f32 to vector<20x128xf32>
    %59 = arith.maximumf %57, %58 : vector<20x128xf32>
    %60 = arith.truncf %59 : vector<20x128xf32> to vector<20x128xbf16>
    %c0_69 = arith.constant 0 : index
    %c0_70 = arith.constant 0 : index
    %c0_71 = arith.constant 0 : index
    %61 = vector.load %arg5[%c0_69, %c0_70, %c0_71] : memref<1x20x128xbf16, #tpu.memory_space<vmem>>, vector<1x20x128xbf16>
    %62 = vector.shape_cast %61 : vector<1x20x128xbf16> to vector<20x128xbf16>
    %63 = vector.shape_cast %60 : vector<20x128xbf16> to vector<1x20x128xbf16>
    tpu.vector_store %arg5[%c0_69, %c0_70, %c0_71], %63 {strides = array<i32>} : memref<1x20x128xbf16, #tpu.memory_space<vmem>>, vector<1x20x128xbf16>,
    return
  }
  func.func @transform_0(%arg0: i32, %arg1: i32) -> (i32, i32, i32) {
    %c0_i32 = arith.constant 0 : i32
    %c0_i32_0 = arith.constant 0 : i32
    %c0_i32_1 = arith.constant 0 : i32
    return %arg0, %c0_i32, %c0_i32_0 : i32, i32, i32
  }
  func.func @transform_1(%arg0: i32, %arg1: i32) -> (i32, i32, i32, i32) {
    %c0_i32 = arith.constant 0 : i32
    %c0_i32_0 = arith.constant 0 : i32
    %c0_i32_1 = arith.constant 0 : i32
    %c0_i32_2 = arith.constant 0 : i32
    return %c0_i32, %c0_i32_0, %c0_i32_1, %arg1 : i32, i32, i32, i32
  }
  func.func @transform_2(%arg0: i32, %arg1: i32) -> (i32, i32) {
    %c0_i32 = arith.constant 0 : i32
    %c0_i32_0 = arith.constant 0 : i32
    return %c0_i32, %arg1 : i32, i32
  }
  func.func @transform_3(%arg0: i32, %arg1: i32) -> (i32, i32, i32) {
    %c0_i32 = arith.constant 0 : i32
    %c0_i32_0 = arith.constant 0 : i32
    return %arg0, %c0_i32, %arg1 : i32, i32, i32
  }
}

module attributes {stable_mosaic.version = 11 : i64} {
  func.func @_mm_bias_shortcut_kernel(%arg0: i32, %arg1: i32, %arg2: i32, %arg3: memref<32x128xbf16, #tpu.memory_space<vmem>>, %arg4: memref<128x128xbf16, #tpu.memory_space<vmem>>, %arg5: memref<32x128xbf16, #tpu.memory_space<vmem>>, %arg6: memref<128x128xbf16, #tpu.memory_space<vmem>>, %arg7: memref<1x128xf32, #tpu.memory_space<vmem>>, %arg8: memref<32x128xf32, #tpu.memory_space<vmem>>, %arg9: memref<32x128xf32, #tpu.memory_space<vmem>>) attributes {dimension_semantics = [#tpu.dimension_semantics<parallel>, #tpu.dimension_semantics<parallel>, #tpu.dimension_semantics<arbitrary>], iteration_bounds = array<i64: 1, 1, 1>, scalar_prefetch = 0 : i64, scratch_operands = 1 : i64, tpu.core_type = #tpu.core_type<tc>, window_params = [{transform_indices = @transform_0, window_bounds = array<i64: 32, 128>}, {transform_indices = @transform_1, window_bounds = array<i64: 128, 128>}, {transform_indices = @transform_2, window_bounds = array<i64: 32, 128>}, {transform_indices = @transform_3, window_bounds = array<i64: 128, 128>}, {transform_indices = @transform_4, window_bounds = array<i64: 1, 128>}, {transform_indices = @transform_5, window_bounds = array<i64: 32, 128>}]} {
    %c0_i32 = arith.constant 0 : i32
    %0 = arith.cmpi eq, %arg2, %c0_i32 : i32
    %1 = arith.extui %0 : i1 to i32
    %c0_i32_0 = arith.constant 0 : i32
    %2 = arith.cmpi ne, %1, %c0_i32_0 : i32
    scf.if %2 {
      %c0_10 = arith.constant 0 : index
      %c0_11 = arith.constant 0 : index
      %12 = vector.load %arg5[%c0_10, %c0_11] : memref<32x128xbf16, #tpu.memory_space<vmem>>, vector<32x128xbf16>
      %c0_12 = arith.constant 0 : index
      %c0_13 = arith.constant 0 : index
      %13 = vector.load %arg6[%c0_12, %c0_13] : memref<128x128xbf16, #tpu.memory_space<vmem>>, vector<128x128xbf16>
      %cst_14 = arith.constant dense<0.000000e+00> : vector<32x128xf32>
      %14 = tpu.matmul %12, %13, %cst_14 {dimension_numbers = #tpu.dot_dimension_numbers<[1], [0], [0], [1], [0, 0, 1, 1], [], []>} : vector<32x128xbf16>, vector<128x128xbf16>, vector<32x128xf32> -> vector<32x128xf32>
      %c0_15 = arith.constant 0 : index
      %c0_16 = arith.constant 0 : index
      %15 = vector.load %arg9[%c0_15, %c0_16] : memref<32x128xf32, #tpu.memory_space<vmem>>, vector<32x128xf32>
      tpu.vector_store %arg9[%c0_15, %c0_16], %14 {strides = array<i32>} : memref<32x128xf32, #tpu.memory_space<vmem>>, vector<32x128xf32>,
    } else {
    }
    %c0 = arith.constant 0 : index
    %c0_1 = arith.constant 0 : index
    %3 = vector.load %arg9[%c0, %c0_1] : memref<32x128xf32, #tpu.memory_space<vmem>>, vector<32x128xf32>
    %c0_2 = arith.constant 0 : index
    %c0_3 = arith.constant 0 : index
    %4 = vector.load %arg3[%c0_2, %c0_3] : memref<32x128xbf16, #tpu.memory_space<vmem>>, vector<32x128xbf16>
    %c0_4 = arith.constant 0 : index
    %c0_5 = arith.constant 0 : index
    %5 = vector.load %arg4[%c0_4, %c0_5] : memref<128x128xbf16, #tpu.memory_space<vmem>>, vector<128x128xbf16>
    %cst = arith.constant dense<0.000000e+00> : vector<32x128xf32>
    %6 = tpu.matmul %4, %5, %cst {dimension_numbers = #tpu.dot_dimension_numbers<[1], [0], [0], [1], [0, 0, 1, 1], [], []>} : vector<32x128xbf16>, vector<128x128xbf16>, vector<32x128xf32> -> vector<32x128xf32>
    %7 = arith.addf %3, %6 : vector<32x128xf32>
    %c0_6 = arith.constant 0 : index
    %c0_7 = arith.constant 0 : index
    %8 = vector.load %arg9[%c0_6, %c0_7] : memref<32x128xf32, #tpu.memory_space<vmem>>, vector<32x128xf32>
    tpu.vector_store %arg9[%c0_6, %c0_7], %7 {strides = array<i32>} : memref<32x128xf32, #tpu.memory_space<vmem>>, vector<32x128xf32>,
    %c0_i32_8 = arith.constant 0 : i32
    %9 = arith.cmpi eq, %arg2, %c0_i32_8 : i32
    %10 = arith.extui %9 : i1 to i32
    %c0_i32_9 = arith.constant 0 : i32
    %11 = arith.cmpi ne, %10, %c0_i32_9 : i32
    scf.if %11 {
      %c0_10 = arith.constant 0 : index
      %c0_11 = arith.constant 0 : index
      %12 = vector.load %arg9[%c0_10, %c0_11] : memref<32x128xf32, #tpu.memory_space<vmem>>, vector<32x128xf32>
      %c0_12 = arith.constant 0 : index
      %c0_13 = arith.constant 0 : index
      %13 = vector.load %arg7[%c0_12, %c0_13] : memref<1x128xf32, #tpu.memory_space<vmem>>, vector<1x128xf32>
      %14 = vector.broadcast %13 : vector<1x128xf32> to vector<32x128xf32>
      %15 = arith.addf %12, %14 : vector<32x128xf32>
      %cst_14 = arith.constant 0.000000e+00 : f32
      %16 = vector.broadcast %cst_14 : f32 to vector<32x128xf32>
      %17 = arith.maximumf %15, %16 : vector<32x128xf32>
      %c0_15 = arith.constant 0 : index
      %c0_16 = arith.constant 0 : index
      %18 = vector.load %arg8[%c0_15, %c0_16] : memref<32x128xf32, #tpu.memory_space<vmem>>, vector<32x128xf32>
      tpu.vector_store %arg8[%c0_15, %c0_16], %17 {strides = array<i32>} : memref<32x128xf32, #tpu.memory_space<vmem>>, vector<32x128xf32>,
    } else {
    }
    return
  }
  func.func @transform_0(%arg0: i32, %arg1: i32, %arg2: i32) -> (i32, i32) {
    %c0_i32 = arith.constant 0 : i32
    return %arg0, %arg2 : i32, i32
  }
  func.func @transform_1(%arg0: i32, %arg1: i32, %arg2: i32) -> (i32, i32) {
    %c0_i32 = arith.constant 0 : i32
    return %arg2, %arg1 : i32, i32
  }
  func.func @transform_2(%arg0: i32, %arg1: i32, %arg2: i32) -> (i32, i32) {
    %c0_i32 = arith.constant 0 : i32
    %c0_i32_0 = arith.constant 0 : i32
    return %arg0, %c0_i32 : i32, i32
  }
  func.func @transform_3(%arg0: i32, %arg1: i32, %arg2: i32) -> (i32, i32) {
    %c0_i32 = arith.constant 0 : i32
    %c0_i32_0 = arith.constant 0 : i32
    return %c0_i32, %arg1 : i32, i32
  }
  func.func @transform_4(%arg0: i32, %arg1: i32, %arg2: i32) -> (i32, i32) {
    %c0_i32 = arith.constant 0 : i32
    %c0_i32_0 = arith.constant 0 : i32
    return %c0_i32, %arg1 : i32, i32
  }
  func.func @transform_5(%arg0: i32, %arg1: i32, %arg2: i32) -> (i32, i32) {
    %c0_i32 = arith.constant 0 : i32
    return %arg0, %arg1 : i32, i32
  }
}

</mosaic_0001>

<bundles_post_ra>
// kernel: bottleneck_forward.3
= control target key start
LH: loop header
LB: loop body
LE: loop exit
PB: predicated region body
PF: predicated region fallthrough
CT: control target
= control target key end

     0   :  { %s721_s1 = inlined_call_operand.vmem [shape: bf16[128,128], index: 1, kind: input, shape index: {}]   ;;  %s722_s0 = inlined_call_operand.vmem [shape: bf16[128,128], index: 0, kind: input, shape index: {}]   ;;  %s723_s2 = inlined_call_operand.vmem [shape: f32[1,128], index: 2, kind: input, shape index: {}]   ;;  %s724_s3 = inlined_call_operand.vmem [shape: bf16[128,128], index: 3, kind: output, shape index: {}]  }
   0x1   :  { %v610_v0 = vld [vmem:[%s721_s1] sm:$0xff]   ;;  %v611_v1 = vld [vmem:[%s721_s1 + $0x8] sm:$0xff]   ;;  %v612_v2 = vld [vmem:[%s721_s1 + $0x10] sm:$0xff]  }
   0x2   :  { %562 = vmatprep.subr.bf16.mxu0 %v610_v0  ;;  %594 = vmatprep.subr.bf16.mxu1 %v610_v0  ;;  %v613_v3 = vld [vmem:[%s721_s1 + $0x18] sm:$0xff]   ;;  %v618_v4 = vld [vmem:[%s722_s0] sm:$0xff]   ;;  %v615_v7 = vld [vmem:[%s721_s1 + $0x28] sm:$0xff]  }
   0x3   :  { %563 = vmatpush3.bf16.msra.mxu0 %v610_v0  ;;  %602 = vmatpush3.bf16.msra.mxu1 %v610_v0  ;;  %v619_v5 = vld [vmem:[%s722_s0 + $0x20] sm:$0xff]   ;;  %v616_v8 = vld [vmem:[%s721_s1 + $0x30] sm:$0xff]   ;;  %v617_v9 = vld [vmem:[%s721_s1 + $0x38] sm:$0xff]  }
   0x4   :  { %564 = vmatprep.subr.bf16.mxu0 %v611_v1  ;;  %595 = vmatprep.subr.bf16.mxu1 %v611_v1  ;;  %v614_v6 = vld [vmem:[%s721_s1 + $0x20] sm:$0xff]   ;;  %v620_v10 = vld [vmem:[%s722_s0 + $0x8] sm:$0xff]   ;;  %v622_v12 = vld [vmem:[%s722_s0 + $0x10] sm:$0xff]  }
   0x5   :  { %578 = vmatprep.mubr.bf16.mxu0 %v618_v4  ;;  %586 = vmatprep.mubr.bf16.mxu1 %v619_v5  ;;  %v621_v11 = vld [vmem:[%s722_s0 + $0x28] sm:$0xff]   ;;  %v623_v13 = vld [vmem:[%s722_s0 + $0x30] sm:$0xff]   ;;  %v624_v14 = vld [vmem:[%s722_s0 + $0x18] sm:$0xff]  }
   0x6   :  { %v625_v15 = vld [vmem:[%s722_s0 + $0x38] sm:$0xff]   ;;  %v466_v16 = vld [vmem:[%s723_s2] ss:$0 sm:$0xff] }
   0x7   :  { %565 = vmatpush3.bf16.msra.mxu0 %v611_v1  ;;  %603 = vmatpush3.bf16.msra.mxu1 %v611_v1 }
   0x8   :  { %566 = vmatprep.subr.bf16.mxu0 %v612_v2  ;;  %596 = vmatprep.subr.bf16.mxu1 %v612_v2 }
   0xb   :  { %567 = vmatpush3.bf16.msra.mxu0 %v612_v2  ;;  %604 = vmatpush3.bf16.msra.mxu1 %v612_v2 }
   0xc   :  { %568 = vmatprep.subr.bf16.mxu0 %v613_v3  ;;  %597 = vmatprep.subr.bf16.mxu1 %v613_v3 }
   0xf   :  { %569 = vmatpush3.bf16.msra.mxu0 %v613_v3  ;;  %605 = vmatpush3.bf16.msra.mxu1 %v613_v3 }
  0x10   :  { %570 = vmatprep.subr.bf16.mxu0 %v614_v6  ;;  %598 = vmatprep.subr.bf16.mxu1 %v614_v6 }
  0x13   :  { %571 = vmatpush3.bf16.msra.mxu0 %v614_v6  ;;  %606 = vmatpush3.bf16.msra.mxu1 %v614_v6 }
  0x14   :  { %572 = vmatprep.subr.bf16.mxu0 %v615_v7  ;;  %599 = vmatprep.subr.bf16.mxu1 %v615_v7 }
  0x17   :  { %573 = vmatpush3.bf16.msra.mxu0 %v615_v7  ;;  %607 = vmatpush3.bf16.msra.mxu1 %v615_v7 }
  0x18   :  { %574 = vmatprep.subr.bf16.mxu0 %v616_v8  ;;  %600 = vmatprep.subr.bf16.mxu1 %v616_v8 }
  0x1b   :  { %575 = vmatpush3.bf16.msra.mxu0 %v616_v8  ;;  %608 = vmatpush3.bf16.msra.mxu1 %v616_v8 }
  0x1c   :  { %576 = vmatprep.subr.bf16.mxu0 %v617_v9  ;;  %601 = vmatprep.subr.bf16.mxu1 %v617_v9 }
  0x1f   :  { %577 = vmatpush3.bf16.msra.mxu0 %v617_v9  ;;  %609 = vmatpush3.bf16.msra.mxu1 %v617_v9 }
  0x22   :  { %579 = vmatmul.mubr.bf16.vlgmr.msra.gmra.mrb[0].mxu0 %v620_v10  ;;  %587 = vmatmul.mubr.bf16.vlgmr.msra.gmra.mrb[0].mxu1 %v621_v11 }
  0x23   :  { %582 = vmatprep.mubr.bf16.mxu0 %v622_v12  ;;  %590 = vmatprep.mubr.bf16.mxu1 %v623_v13 }
  0x2a   :  { %583 = vmatmul.mubr.bf16.gmra.mrb[4].mxu0 %v624_v14  ;;  %591 = vmatmul.mubr.bf16.gmra.mrb[4].mxu1 %v625_v15 }
  0xf5   :  { %v580_v17 = vpop.f32.mrb[0].mxu0  ;;  %v588_v18 = vpop.f32.mrb[0].mxu1 }
  0xf6   :  { %v336_v19 = vadd.f32 %v580_v17, %v466_v16  ;;  %v344_v20 = vadd.f32 %v588_v18, %v466_v16  ;;  %v213_v21 = vpop.f32.mrb[1].mxu0  ;;  %v245_v22 = vpop.f32.mrb[1].mxu1 }
  0xf7   :  { %v334_v23 = vadd.f32 %v466_v16, %v213_v21  ;;  %v342_v24 = vadd.f32 %v466_v16, %v245_v22  ;;  %v581_v25 = vpop.f32.mrb[2].mxu0  ;;  %v589_v26 = vpop.f32.mrb[2].mxu1 }
  0xf8   :  { %v337_v27 = vadd.f32 %v581_v25, %v466_v16  ;;  %v345_v28 = vadd.f32 %v589_v26, %v466_v16  ;;  %v216_v29 = vpop.f32.mrb[3].mxu0  ;;  %v248_v30 = vpop.f32.mrb[3].mxu1  ;;  %v352_v33 = vmax.f32 %v336_v19, 0.0  ;;  %v360_v34 = vmax.f32 %v344_v20, 0.0 }
  0xf9   :  { %v335_v31 = vadd.f32 %v466_v16, %v216_v29  ;;  %v343_v32 = vadd.f32 %v466_v16, %v248_v30  ;;  %v350_v37 = vmax.f32 %v334_v23, 0.0  ;;  %v358_v38 = vmax.f32 %v342_v24, 0.0 }
  0xfa   :  { %v353_v35 = vmax.f32 %v337_v27, 0.0  ;;  %v361_v36 = vmax.f32 %v345_v28, 0.0 }
  0xfb   :  { %v351_v39 = vmax.f32 %v335_v31, 0.0  ;;  %v359_v40 = vmax.f32 %v343_v32, 0.0 }
  0xfc   :  { %v507_v41 = vpack.c.bf16 %v353_v35, %v352_v33  ;;  %v527_v42 = vpack.c.bf16 %v361_v36, %v360_v34 }
  0xfd   :  { %v502_v43 = vpack.c.bf16 %v351_v39, %v350_v37  ;;  %v522_v44 = vpack.c.bf16 %v359_v40, %v358_v38  ;;  %v584_v45 = vpop.f32.mrb[4].mxu0  ;;  %v592_v46 = vpop.f32.mrb[4].mxu1 }
  0xfe   :  { %539 = vst [vmem:[%s724_s3 + $0x8] sm:$0xff] %v507_v41   ;;  %543 = vst [vmem:[%s724_s3 + $0x28] sm:$0xff] %v527_v42   ;;  %v340_v47 = vadd.f32 %v584_v45, %v466_v16  ;;  %v348_v48 = vadd.f32 %v592_v46, %v466_v16  ;;  %v229_v49 = vpop.f32.mrb[5].mxu0  ;;  %v261_v50 = vpop.f32.mrb[5].mxu1 }
  0xff   :  { %503 = vst [vmem:[%s724_s3] sm:$0xff] %v502_v43   ;;  %542 = vst [vmem:[%s724_s3 + $0x20] sm:$0xff] %v522_v44   ;;  %v338_v51 = vadd.f32 %v466_v16, %v229_v49  ;;  %v346_v52 = vadd.f32 %v466_v16, %v261_v50  ;;  %v585_v53 = vpop.f32.mrb[6].mxu0  ;;  %v593_v54 = vpop.f32.mrb[6].mxu1 }
 0x100   :  { %v341_v55 = vadd.f32 %v585_v53, %v466_v16  ;;  %v349_v56 = vadd.f32 %v593_v54, %v466_v16  ;;  %v232_v57 = vpop.f32.mrb[7].mxu0  ;;  %v264_v58 = vpop.f32.mrb[7].mxu1  ;;  %v356_v61 = vmax.f32 %v340_v47, 0.0  ;;  %v364_v62 = vmax.f32 %v348_v48, 0.0 }
 0x101   :  { %v339_v59 = vadd.f32 %v466_v16, %v232_v57  ;;  %v347_v60 = vadd.f32 %v466_v16, %v264_v58  ;;  %v354_v1 = vmax.f32 %v338_v51, 0.0  ;;  %v362_v2 = vmax.f32 %v346_v52, 0.0 }
 0x102   :  { %v357_v63 = vmax.f32 %v341_v55, 0.0  ;;  %v365_v0 = vmax.f32 %v349_v56, 0.0 }
 0x103   :  { %v355_v3 = vmax.f32 %v339_v59, 0.0  ;;  %v363_v4 = vmax.f32 %v347_v60, 0.0 }
 0x104   :  { %v517_v5 = vpack.c.bf16 %v357_v63, %v356_v61  ;;  %v537_v6 = vpack.c.bf16 %v365_v0, %v364_v62 }
 0x105   :  { %v512_v7 = vpack.c.bf16 %v355_v3, %v354_v1  ;;  %v532_v8 = vpack.c.bf16 %v363_v4, %v362_v2 }
 0x106   :  { %541 = vst [vmem:[%s724_s3 + $0x18] sm:$0xff] %v517_v5   ;;  %545 = vst [vmem:[%s724_s3 + $0x38] sm:$0xff] %v537_v6  }
 0x107   :  { %540 = vst [vmem:[%s724_s3 + $0x10] sm:$0xff] %v512_v7   ;;  %544 = vst [vmem:[%s724_s3 + $0x30] sm:$0xff] %v532_v8  }

// kernel: bottleneck_forward.5
= control target key start
LH: loop header
LB: loop body
LE: loop exit
PB: predicated region body
PF: predicated region fallthrough
CT: control target
= control target key end

     0   :  { %s582_s0 = inlined_call_operand.vmem [shape: bf16[32,128], index: 0, kind: input, shape index: {}]   ;;  %s583_s1 = inlined_call_operand.vmem [shape: bf16[128,128], index: 1, kind: input, shape index: {}]   ;;  %s584_s2 = inlined_call_operand.vmem [shape: bf16[32,128], index: 2, kind: input, shape index: {}]   ;;  %s585_s3 = inlined_call_operand.vmem [shape: bf16[128,128], index: 3, kind: input, shape index: {}]   ;;  %s586_s4 = inlined_call_operand.vmem [shape: f32[1,128], index: 4, kind: input, shape index: {}]   ;;  %s587_s5 = inlined_call_operand.hbm [shape: f32[32,128], index: 5, kind: output, shape index: {}]  }
   0x1   :  { %v430_v0 = vld [vmem:[%s585_s3] sm:$0xff]   ;;  %v432_v2 = vld [vmem:[%s585_s3 + $0x8] sm:$0xff]   ;;  %v434_v4 = vld [vmem:[%s585_s3 + $0x10] sm:$0xff]  }
   0x2   :  { %v431_v1 = vld [vmem:[%s583_s1] sm:$0xff]   ;;  %383 = vmatprep.subr.bf16.mxu1 %v430_v0  ;;  %v433_v3 = vld [vmem:[%s583_s1 + $0x8] sm:$0xff]   ;;  %v435_v5 = vld [vmem:[%s583_s1 + $0x10] sm:$0xff]  }
   0x3   :  { %403 = vmatprep.subr.bf16.mxu0 %v431_v1  ;;  %384 = vmatpush3.bf16.msra.mxu1 %v430_v0  ;;  %v436_v6 = vld [vmem:[%s585_s3 + $0x18] sm:$0xff]   ;;  %v438_v8 = vld [vmem:[%s585_s3 + $0x20] sm:$0xff]   ;;  %v440_v10 = vld [vmem:[%s585_s3 + $0x28] sm:$0xff]  }
   0x4   :  { %404 = vmatpush3.bf16.msra.mxu0 %v431_v1  ;;  %385 = vmatprep.subr.bf16.mxu1 %v432_v2  ;;  %v437_v7 = vld [vmem:[%s583_s1 + $0x18] sm:$0xff]   ;;  %v439_v9 = vld [vmem:[%s583_s1 + $0x20] sm:$0xff]   ;;  %v441_v11 = vld [vmem:[%s583_s1 + $0x28] sm:$0xff]  }
   0x5   :  { %405 = vmatprep.subr.bf16.mxu0 %v433_v3  ;;  %v446_v12 = vld [vmem:[%s584_s2] sm:$0xff]   ;;  %v442_v14 = vld [vmem:[%s585_s3 + $0x30] sm:$0xff]  }
   0x6   :  { %v447_v13 = vld [vmem:[%s582_s0] sm:$0xff]   ;;  %399 = vmatprep.mubr.bf16.mxu1 %v446_v12 }
   0x7   :  { %386 = vmatpush3.bf16.msra.mxu1 %v432_v2  ;;  %419 = vmatprep.mubr.bf16.mxu0 %v447_v13 }
   0x8   :  { %406 = vmatpush3.bf16.msra.mxu0 %v433_v3  ;;  %387 = vmatprep.subr.bf16.mxu1 %v434_v4 }
   0x9   :  { %407 = vmatprep.subr.bf16.mxu0 %v435_v5 }
   0xb   :  { %388 = vmatpush3.bf16.msra.mxu1 %v434_v4 }
   0xc   :  { %408 = vmatpush3.bf16.msra.mxu0 %v435_v5  ;;  %389 = vmatprep.subr.bf16.mxu1 %v436_v6 }
   0xd   :  { %409 = vmatprep.subr.bf16.mxu0 %v437_v7 }
   0xf   :  { %390 = vmatpush3.bf16.msra.mxu1 %v436_v6 }
  0x10   :  { %410 = vmatpush3.bf16.msra.mxu0 %v437_v7  ;;  %391 = vmatprep.subr.bf16.mxu1 %v438_v8 }
  0x11   :  { %411 = vmatprep.subr.bf16.mxu0 %v439_v9 }
  0x13   :  { %392 = vmatpush3.bf16.msra.mxu1 %v438_v8 }
  0x14   :  { %412 = vmatpush3.bf16.msra.mxu0 %v439_v9  ;;  %393 = vmatprep.subr.bf16.mxu1 %v440_v10 }
  0x15   :  { %10 = vsyncpa [#allocation4], 0  ;;  %413 = vmatprep.subr.bf16.mxu0 %v441_v11  ;;  %v443_v15 = vld [vmem:[%s583_s1 + $0x30] sm:$0xff]   ;;  %v444_v16 = vld [vmem:[%s585_s3 + $0x38] sm:$0xff]  }
  0x16   :  { %v445_v17 = vld [vmem:[%s583_s1 + $0x38] sm:$0xff]   ;;  %v448_v18 = vld [vmem:[%s584_s2 + $0x8] sm:$0xff]   ;;  %v362_v22 = vld [vmem:[%s586_s4] ss:$0 sm:$0xff] }
  0x17   :  { %394 = vmatpush3.bf16.msra.mxu1 %v440_v10  ;;  %v449_v19 = vld [vmem:[%s582_s0 + $0x8] sm:$0xff]   ;;  %s474_s0 = smov [#allocation3]  }
  0x18   :  { %414 = vmatpush3.bf16.msra.mxu0 %v441_v11  ;;  %395 = vmatprep.subr.bf16.mxu1 %v442_v14  ;;  %s331_s2 = sshll.u32 %s474_s0, 4  ;;  %s332_s2 = int_to_ptr.vmem [resolvable:$true] %s331_s2 }
  0x19   :  { %415 = vmatprep.subr.bf16.mxu0 %v443_v15  ;;  %s450_s4 = scalar_lea.vmem %s332_s2, 512  ;;  %p455_p1 = scmp.lt.s32.totalorder %s332_s2, %s332_s2 }
  0x1a   :  { %p451_p0 = scmp.ne.s32.totalorder %s332_s2, %s450_s4  ;;  %p456_p2 = scmp.lt.s32.totalorder %s450_s4, %s450_s4 }
  0x1b   :  { %396 = vmatpush3.bf16.msra.mxu1 %v442_v14 }
  0x1c   :  { %416 = vmatpush3.bf16.msra.mxu0 %v443_v15  ;;  %397 = vmatprep.subr.bf16.mxu1 %v444_v16  ;;  %p457_p3 = por %p456_p2, %p455_p1 }
  0x1d   :  { %417 = vmatprep.subr.bf16.mxu0 %v445_v17 }
  0x1e   :  { %p458_p4 = pnand %p457_p3, %p451_p0 }
  0x1f   :  { %398 = vmatpush3.bf16.msra.mxu1 %v444_v16 }
  0x20   :  { %418 = vmatpush3.bf16.msra.mxu0 %v445_v17 }
  0x22   :  { %400 = vmatmul.mubr.bf16.vlgmr.msra.gmra.mrb[0].mxu1 %v448_v18 }
  0x23   :  { %420 = vmatmul.mubr.bf16.vlgmr.msra.gmra.mrb[0].mxu0 %v449_v19 }
  0xf5   :  { %v401_v20 = vpop.f32.mrb[0].mxu1 }
  0xf6   :  { %v421_v21 = vpop.f32.mrb[0].mxu0  ;;  %v140_v23 = vpop.f32.mrb[1].mxu1 }
  0xf7   :  { %v294_v24 = vadd.f32 %v421_v21, %v401_v20  ;;  %v277_v25 = vpop.f32.mrb[1].mxu0  ;;  %v402_v26 = vpop.f32.mrb[2].mxu1 }
  0xf8   :  { %v292_v27 = vadd.f32 %v277_v25, %v140_v23  ;;  %v422_v28 = vpop.f32.mrb[2].mxu0  ;;  %v143_v29 = vpop.f32.mrb[3].mxu1 }
  0xf9   :  { %v316_v30 = vadd.f32 %v362_v22, %v294_v24  ;;  %v295_v31 = vadd.f32 %v422_v28, %v402_v26  ;;  %v280_v32 = vpop.f32.mrb[3].mxu0 }
  0xfa   :  { %v314_v33 = vadd.f32 %v362_v22, %v292_v27  ;;  %v293_v34 = vadd.f32 %v280_v32, %v143_v29 }
  0xfb   :  { %v320_v35 = vmax.f32 %v316_v30, 0.0  ;;  %v317_v36 = vadd.f32 %v362_v22, %v295_v31 }
  0xfc   :  { %v318_v37 = vmax.f32 %v314_v33, 0.0  ;;  %v315_v38 = vadd.f32 %v362_v22, %v293_v34 }
  0xfd   :  { %324 = vst [vmem:[#allocation3 + $0x10] sm:$0xff] %v320_v35  ;;  %v321_v39 = vmax.f32 %v317_v36, 0.0 }
  0xfe   :  { %322 = vst [vmem:[#allocation3] sm:$0xff] %v318_v37  ;;  %v319_v40 = vmax.f32 %v315_v38, 0.0 }
  0xff   :  { %325 = vst [vmem:[#allocation3 + $0x18] sm:$0xff] %v321_v39 }
 0x100   :  { %323 = vst [vmem:[#allocation3 + $0x8] sm:$0xff] %v319_v40 }
 0x101   :  { %461 = shalt.err (!%p458_p4)
}
 0x102   :  { %s462_s10 = scalar_lea.hbm %s587_s5, 512 }
 0x103   :  { %p463_p5 = scmp.ne.s32.totalorder %s587_s5, %s462_s10  ;;  %p466_p6 = scmp.lt.u32.totalorder %s462_s10, %s587_s5 }
 0x105   :  { %p468_p7 = pnand %p466_p6, %p463_p5 }
 0x107   :  { %471 = shalt.err (!%p468_p7)
}
 0x108   :  { %s475_s15 = smov 128   ;;  %s476_s16 = smov 8  }
 0x109   :  { %337 = dma.vmem_to_hbm [thread:$0]  %s332_s2, 512, %s587_s5, [#allocation4], %s475_s15, %s475_s15, %s476_s16  }
 0x10a   :  { %472 = dma.done.wait [#allocation4], 512  }
 0x10b   :  { %473 = vsyncadd [#allocation4], 4294966784 }
 0x10c   :  { %341 = vsyncpa [#allocation4], 1 }

// kernel: bottleneck_forward.4
= control target key start
LH: loop header
LB: loop body
LE: loop exit
PB: predicated region body
PF: predicated region fallthrough
CT: control target
= control target key end

     0   :  { %s2255_s12 = smov 0   ;;  %s2257_s13 = smov 0   ;;  %s2557_s0 = inlined_call_operand.vmem [shape: bf16[8,32,128], index: 0, kind: input, shape index: {}]   ;;  %s2558_s1 = inlined_call_operand.vmem [shape: bf16[3,3,128,128], index: 1, kind: input, shape index: {}]   ;;  %s2559_s2 = inlined_call_operand.vmem [shape: f32[1,128], index: 2, kind: input, shape index: {}]   ;;  %s2560_s3 = inlined_call_operand.vmem [shape: bf16[2,20,128], index: 3, kind: output, shape index: {}]  }
   0x1   :  { %s2259_s14 = smov 0  }
   0x2 LB: > { %s25_s15 = sadd.s32 1, %s2229_s13  ;;  %p1580_p0 = scmp.ge.s32.totalorder %s2233_s14, 1  ;;  %s2233_s14 = sphi %s2259_s14, %s13_s14   ;;  %s2229_s13 = sphi %s2257_s13, %s2562_s13   ;;  %s2225_s12 = sphi %s2255_s12, %s2561_s12  }
   0x3   : > { %p27_p1 = scmp.ge.s32.totalorder %s25_s15, 2  ;;  %p170_p2 = scmp.lt.s32.totalorder %s2233_s14, 3 }
   0x5   : > { %s2564_s15 = smov (%p27_p1, %s25_s15), 0  ;;  %p171_p3 = pnand %p1580_p0, %p170_p2 }
   0x6   : > { %v2124_v0 = vld [vmem:[%s2558_s1 + $0x40] sm:$0xff] (!%p171_p3)   ;;  %s1581_s18 = sshll.u32 (!%p171_p3), %s2225_s12, 2  ;;  %v2126_v2 = vld [vmem:[%s2558_s1 + $0x48] sm:$0xff] (!%p171_p3)   ;;  %v2128_v4 = vld [vmem:[%s2558_s1 + $0x50] sm:$0xff] (!%p171_p3)   ;;  %vm501_vm0 = vsmask.f32 (!%p171_p3), 7424 }
   0x7   : > { %174 = sbr.rel (%p171_p3) target bundleno = 391 (0x187), region = 32  ;;  %v2125_v1 = vld [vmem:[%s2558_s1] sm:$0xff] (!%p171_p3)   ;;  %1919 = vmatprep.subr.bf16.mxu0 (!%p171_p3), %v2124_v0  ;;  %p206_p4 = scmp.lt.s32.totalorder (!%p171_p3), %s1581_s18, 7  ;;  %v2127_v3 = vld [vmem:[%s2558_s1 + $0x8] sm:$0xff] (!%p171_p3)   ;;  %v2129_v5 = vld [vmem:[%s2558_s1 + $0x10] sm:$0xff] (!%p171_p3)   ;;  %vm1335_vm2 = vcmask (!%p171_p3), 1044480  }
   0x8   : > { %1939 = vmatprep.subr.bf16.mxu1 (!%p171_p3), %v2125_v1  ;;  %1920 = vmatpush3.bf16.msra.mxu0 (!%p171_p3), %v2124_v0  ;;  %v2130_v6 = vld [vmem:[%s2558_s1 + $0x58] sm:$0xff] (!%p171_p3)   ;;  %v2132_v8 = vld [vmem:[%s2558_s1 + $0x60] sm:$0xff] (!%p171_p3)   ;;  %v2134_v10 = vld [vmem:[%s2558_s1 + $0x68] sm:$0xff] (!%p171_p3)   ;;  %vm1046_vm1 = vsmask.f32 (!%p171_p3), 5376  ;;  %p219_p5 = scmp.lt.s32.totalorder (!%p171_p3), %s2225_s12, 1 }
   0x9   : > { %1940 = vmatpush3.bf16.msra.mxu1 (!%p171_p3), %v2125_v1  ;;  %1921 = vmatprep.subr.bf16.mxu0 (!%p171_p3), %v2126_v2  ;;  %v2131_v7 = vld [vmem:[%s2558_s1 + $0x18] sm:$0xff] (!%p171_p3)   ;;  %v2133_v9 = vld [vmem:[%s2558_s1 + $0x20] sm:$0xff] (!%p171_p3)   ;;  %v2135_v11 = vld [vmem:[%s2558_s1 + $0x28] sm:$0xff] (!%p171_p3)  }
   0xa   : > { %1941 = vmatprep.subr.bf16.mxu1 (!%p171_p3), %v2127_v3  ;;  %v2136_v14 = vld [vmem:[%s2558_s1 + $0x70] sm:$0xff] (!%p171_p3)   ;;  %v2138_v16 = vld [vmem:[%s2558_s1 + $0x78] sm:$0xff] (!%p171_p3)   ;;  %v2144_v19 = vld [vmem:[%s2558_s1 + $0x80] sm:$0xff] (!%p171_p3)  }
   0xb   : > { %v2137_v15 = vld [vmem:[%s2558_s1 + $0x30] sm:$0xff] (!%p171_p3)   ;;  %v2139_v17 = vld [vmem:[%s2558_s1 + $0x38] sm:$0xff] (!%p171_p3)   ;;  %v2145_v21 = vld [vmem:[%s2558_s1 + $0xc0] sm:$0xff] (!%p171_p3)  }
   0xc   : > { %1922 = vmatpush3.bf16.msra.mxu0 (!%p171_p3), %v2126_v2  ;;  %v2146_v23 = vld [vmem:[%s2558_s1 + $0x88] sm:$0xff] (!%p171_p3)   ;;  %v2148_v27 = vld [vmem:[%s2558_s1 + $0x90] sm:$0xff] (!%p171_p3)   ;;  %v2150_v33 = vld [vmem:[%s2558_s1 + $0x98] sm:$0xff] (!%p171_p3)  }
   0xd   : > { %1942 = vmatpush3.bf16.msra.mxu1 (!%p171_p3), %v2127_v3  ;;  %1923 = vmatprep.subr.bf16.mxu0 (!%p171_p3), %v2128_v4  ;;  %v2147_v24 = vld [vmem:[%s2558_s1 + $0xc8] sm:$0xff] (!%p171_p3)   ;;  %v2149_v28 = vld [vmem:[%s2558_s1 + $0xd0] sm:$0xff] (!%p171_p3)   ;;  %v2151_v34 = vld [vmem:[%s2558_s1 + $0xd8] sm:$0xff] (!%p171_p3)  }
   0xe   : > { %s2566_s18 = smov (!%p206_p4, %s1581_s18), 7  ;;  %1943 = vmatprep.subr.bf16.mxu1 %v2129_v5  ;;  %v2152_v37 = vld [vmem:[%s2558_s1 + $0xa0] sm:$0xff]   ;;  %v2154_v39 = vld [vmem:[%s2558_s1 + $0xa8] sm:$0xff]   ;;  %v2156_v41 = vld [vmem:[%s2558_s1 + $0xb0] sm:$0xff]   ;;  %s2568_s12 = smov (!%p219_p5, %s2225_s12), 1 }
   0xf   : > { %s1820_s6 = sshll.u32 %s2566_s18, 4  ;;  %v2153_v38 = vld [vmem:[%s2558_s1 + $0xe0] sm:$0xff]   ;;  %v2155_v40 = vld [vmem:[%s2558_s1 + $0xe8] sm:$0xff]   ;;  %v2157_v42 = vld [vmem:[%s2558_s1 + $0xf0] sm:$0xff]  }
  0x10   : > { %1924 = vmatpush3.bf16.msra.mxu0 %v2128_v4  ;;  %s2309_s17 = scalar_lea.vmem %s2557_s0, %s1820_s6  ;;  %v2158_v44 = vld [vmem:[%s2558_s1 + $0xb8] sm:$0xff]   ;;  %v2161_v50 = vld [vmem:[%s2558_s1 + $0x100] sm:$0xff]   ;;  %v2165_v55 = vld [vmem:[%s2558_s1 + $0x108] sm:$0xff]   ;;  %s2099_s6 = smul.u32 12, %s2568_s12 }
  0x11   : > { %1944 = vmatpush3.bf16.msra.mxu1 %v2129_v5  ;;  %1925 = vmatprep.subr.bf16.mxu0 %v2130_v6  ;;  %v2140_v12 = vld [vmem:[%s2309_s17 + $0x10] sm:$0xff]   ;;  %v2141_v13 = vld [vmem:[%s2309_s17] sm:$0xff]   ;;  %v2142_v18 = vld [vmem:[%s2309_s17 + $0x18] ss:$0 sps:$4 sm:$0x33]  }
  0x12   : > { %1945 = vmatprep.subr.bf16.mxu1 %v2131_v7  ;;  %1935 = vmatprep.mubr.bf16.mxu0 %v2140_v12  ;;  %v2143_v20 = vld [vmem:[%s2309_s17 + $0x8] ss:$0 sps:$4 sm:$0x33]   ;;  %v505_v22 = vshll.u32 %v2141_v13, 16  ;;  %v503_v25 = vshrl.u32 %v2141_v13, 16  ;;  %v2162_v32 = vld [vmem:[%s2309_s17 + $0x20] sm:$0xff]   ;;  %s226_s9 = scalar_lea.vmem %s2560_s3, %s2099_s6 }
  0x13   : > { %1955 = vmatprep.mubr.bf16.mxu1 %v2141_v13  ;;  %v2160_v29 = vld [vmem:[%s2309_s17 + $0x8] ss:$0 sps:$4 sm:$0x77]   ;;  %v902_v43 = vshll.u32 %v2162_v32, 16  ;;  %v2159_v45 = vld [vmem:[%s2558_s1 + $0xf8] sm:$0xff]   ;;  %v900_v48 = vshrl.u32 %v2162_v32, 16 }
  0x14   : > { %1926 = vmatpush3.bf16.msra.mxu0 %v2130_v6  ;;  %v507_v26 = vrot.slane %v505_v22, 1  ;;  %v510_v31 = vshll.u32 %v2160_v29, 16  ;;  %v514_v46 = vshrl.u32 %v2160_v29, 16  ;;  %v2385_v47 = vld [vmem:[%s2309_s17 + $0x28] ss:$0 sps:$4 sm:$0x77]  }
  0x15   : > { %1946 = vmatpush3.bf16.msra.mxu1 %v2131_v7  ;;  %1927 = vmatprep.subr.bf16.mxu0 %v2132_v8  ;;  %v904_v49 = vrot.slane %v902_v43, 1  ;;  %v907_v51 = vshll.u32 %v2385_v47, 16  ;;  %v2163_v52 = vld [vmem:[%s2309_s17 + $0x28] ss:$0 sps:$4 sm:$0x33]   ;;  %v2164_v53 = vld [vmem:[%s2558_s1 + $0x140] sm:$0xff]  }
  0x16   : > { %1947 = vmatprep.subr.bf16.mxu1 %v2133_v9  ;;  %v508_v30 = vor.u32 %v507_v26, %v503_v25  ;;  %v512_v35 = vrot.slane %v510_v31, 1  ;;  %v2166_v58 = vld [vmem:[%s2558_s1 + $0x148] sm:$0xff]   ;;  %v2179_v59 = vld [vmem:[%s2309_s17 + $0x30] sm:$0xff]   ;;  %v2169_v63 = vld [vmem:[%s2558_s1 + $0x118] sm:$0xff]  }
  0x17   : > { %v905_v56 = vor.u32 %v904_v49, %v900_v48  ;;  %v2398_v57 = vrot.slane %v907_v51, 1  ;;  %v2167_v61 = vld [vmem:[%s2558_s1 + $0x110] sm:$0xff]   ;;  %v2170_v0 = vld [vmem:[%s2558_s1 + $0x158] sm:$0xff]   ;;  %v2171_v1 = vld [vmem:[%s2558_s1 + $0x120] sm:$0xff]  }
  0x18   : > { %1928 = vmatpush3.bf16.msra.mxu0 %v2132_v8  ;;  %v513_v36 = vsel %vm501_vm0, %v508_v30, %v512_v35  ;;  %v516_v54 = vor.u32 %v514_v46, %v512_v35  ;;  %v2168_v62 = vld [vmem:[%s2558_s1 + $0x150] sm:$0xff]   ;;  %v2172_v2 = vld [vmem:[%s2558_s1 + $0x160] sm:$0xff]   ;;  %v2173_v5 = vld [vmem:[%s2558_s1 + $0x128] sm:$0xff]  }
  0x19   : > { %1948 = vmatpush3.bf16.msra.mxu1 %v2133_v9  ;;  %1929 = vmatprep.subr.bf16.mxu0 %v2134_v10  ;;  %v910_v60 = vsel %vm501_vm0, %v905_v56, %v2398_v57  ;;  %v1015_v3 = vld [vmem:[%s2309_s17] sm:$0xc]  ;;  %v2426_v4 = vld [vmem:[%s2309_s17 + $0x4] sm:$0xf]  ;;  %v2174_v6 = vld [vmem:[%s2558_s1 + $0x168] sm:$0xff]  }
  0x1a   : > { %1949 = vmatprep.subr.bf16.mxu1 %v2135_v11  ;;  %v1749_v7 = vcombine.low %v1015_v3, %v2426_v4  ;;  %v2436_v8 = vld [vmem:[%s2309_s17 + $0x8] sm:$0x1f]   ;;  %v2175_v9 = vld [vmem:[%s2558_s1 + $0x130] sm:$0xff]   ;;  %v2178_v22 = vld [vmem:[%s2558_s1 + $0x178] sm:$0xff]  }
  0x1b   : > { %v2176_v12 = vld [vmem:[%s2558_s1 + $0x170] sm:$0xff]   ;;  %v2188_v46 = vld [vmem:[%s2558_s1 + $0x198] sm:$0xff]   ;;  %v2190_v48 = vld [vmem:[%s2558_s1 + $0x1a0] sm:$0xff]  }
  0x1c   : > { %1930 = vmatpush3.bf16.msra.mxu0 %v2134_v10  ;;  %v2201_v10 = vld [vmem:[%s2309_s17 + $0x10] sm:$0xfc]   ;;  %v1048_v13 = vshrl.u32 %v1749_v7, 16  ;;  %v2191_v49 = vld [vmem:[%s2558_s1 + $0x1e0] sm:$0xff]   ;;  %v2193_v51 = vld [vmem:[%s2558_s1 + $0x1e8] sm:$0xff]  }
  0x1d   : > { %1950 = vmatpush3.bf16.msra.mxu1 %v2135_v11  ;;  %1931 = vmatprep.subr.bf16.mxu0 %v2136_v14  ;;  %v2202_v11 = vld [vmem:[%s2309_s17 + $0x18] sm:$0x1f]   ;;  %v2208_v3 = vld [vmem:[%s2558_s1 + $0x230] sm:$0xff]  }
  0x1e   : > { %1951 = vmatprep.subr.bf16.mxu1 %v2137_v15  ;;  %v2197_v56 = vld [vmem:[%s2558_s1 + $0x1f8] sm:$0xff]  }
  0x20   : > { %1932 = vmatpush3.bf16.msra.mxu0 %v2136_v14  ;;  %v1051_v14 = vshll.u32 %v1749_v7, 16 }
  0x21   : > { %1952 = vmatpush3.bf16.msra.mxu1 %v2137_v15  ;;  %1933 = vmatprep.subr.bf16.mxu0 %v2138_v16  ;;  %v1056_v15 = vshrl.u32 %v2436_v8, 16 }
  0x22   : > { %1953 = vmatprep.subr.bf16.mxu1 %v2139_v17  ;;  %v1053_v25 = vrot.slane %v1051_v14, 3 }
  0x23   : > { %v1058_v26 = vrot.slane %v1056_v15, 2 }
  0x24   : > { %1934 = vmatpush3.bf16.msra.mxu0 %v2138_v16  ;;  %v1059_v16 = vshll.u32 %v2436_v8, 16 }
  0x25   : > { %1954 = vmatpush3.bf16.msra.mxu1 %v2139_v17  ;;  %1959 = vmatprep.subr.bf16.mxu0 %v2144_v19  ;;  %v1197_v17 = vshrl.u32 %v2201_v10, 16 }
  0x26   : > { %1979 = vmatprep.subr.bf16.mxu1 %v2145_v21 }
  0x27   : > { %1936 = vmatmul.mubr.bf16.vlgmr.msra.gmra.mrb[0].mxu0 %v2142_v18  ;;  %v1200_v18 = vshll.u32 %v2201_v10, 16 }
  0x28   : > { %1956 = vmatmul.mubr.bf16.vlgmr.msra.gmra.mrb[0].mxu1 %v2143_v20  ;;  %1960 = vmatpush3.bf16.msra.mxu0 %v2144_v19  ;;  %v1205_v19 = vshrl.u32 %v2202_v11, 16  ;;  %v1208_v20 = vshll.u32 %v2202_v11, 16 }
  0x29   : > { %1980 = vmatpush3.bf16.msra.mxu1 %v2145_v21  ;;  %1961 = vmatprep.subr.bf16.mxu0 %v2146_v23  ;;  %v2177_v21 = vld [vmem:[%s2558_s1 + $0x138] sm:$0xff]   ;;  %v1202_v29 = vrot.slane %v1200_v18, 3 }
  0x2a   : > { %1981 = vmatprep.subr.bf16.mxu1 %v2147_v24  ;;  %1995 = vmatprep.mubr.bf16.mxu1 %v2162_v32  ;;  %v1207_v30 = vrot.slane %v1205_v19, 2  ;;  %v1210_v31 = vrot.slane %v1208_v20, 3  ;;  %v2181_v32 = vld [vmem:[%s2558_s1 + $0x180] sm:$0xff]  }
  0x2b   : > { %1975 = vmatprep.mubr.bf16.mxu0 %v513_v36 }
  0x2c   : > { %1962 = vmatpush3.bf16.msra.mxu0 %v2146_v23  ;;  %v911_v23 = vshrl.u32 %v2385_v47, 16  ;;  %v2189_v47 = vld [vmem:[%s2558_s1 + $0x1d8] sm:$0xff]  }
  0x2d   : > { %1982 = vmatpush3.bf16.msra.mxu1 %v2147_v24  ;;  %1963 = vmatprep.subr.bf16.mxu0 %v2148_v27  ;;  %v1050_v24 = vrot.slane %v1048_v13, 2 }
  0x2e   : > { %1983 = vmatprep.subr.bf16.mxu1 %v2149_v28 }
  0x2f   : > { %v1054_v35 = vor.u32 %v1053_v25, %v1050_v24 }
  0x30   : > { %1964 = vmatpush3.bf16.msra.mxu0 %v2148_v27  ;;  %v1061_v27 = vrot.slane %v1059_v16, 3 }
  0x31   : > { %1984 = vmatpush3.bf16.msra.mxu1 %v2149_v28  ;;  %1965 = vmatprep.subr.bf16.mxu0 %v2150_v33  ;;  %v1199_v28 = vrot.slane %v1197_v17, 2 }
  0x32   : > { %1985 = vmatprep.subr.bf16.mxu1 %v2151_v34  ;;  %v2462_v36 = vor.u32 %v1061_v27, %v1058_v26 }
  0x34   : > { %1966 = vmatpush3.bf16.msra.mxu0 %v2150_v33  ;;  %v2183_v33 = vld [vmem:[%s2558_s1 + $0x1c0] sm:$0xff]  }
  0x35   : > { %1986 = vmatpush3.bf16.msra.mxu1 %v2151_v34  ;;  %1967 = vmatprep.subr.bf16.mxu0 %v2152_v37  ;;  %v2180_v34 = vld [vmem:[%s2309_s17 + $0x38] ss:$0 sps:$4 sm:$0x33]  }
  0x36   : > { %1987 = vmatprep.subr.bf16.mxu1 %v2153_v38 }
  0x38   : > { %1968 = vmatpush3.bf16.msra.mxu0 %v2152_v37  ;;  %v913_v37 = vor.u32 %v911_v23, %v2398_v57 }
  0x39   : > { %1988 = vmatpush3.bf16.msra.mxu1 %v2153_v38  ;;  %1969 = vmatprep.subr.bf16.mxu0 %v2154_v39  ;;  %v1203_v38 = vor.u32 %v1202_v29, %v1199_v28 }
  0x3a   : > { %1989 = vmatprep.subr.bf16.mxu1 %v2155_v40 }
  0x3c   : > { %1970 = vmatpush3.bf16.msra.mxu0 %v2154_v39  ;;  %v2465_v39 = vor.u32 %v1210_v31, %v1207_v30 }
  0x3d   : > { %1990 = vmatpush3.bf16.msra.mxu1 %v2155_v40  ;;  %1971 = vmatprep.subr.bf16.mxu0 %v2156_v41  ;;  %v2184_v40 = vld [vmem:[%s2558_s1 + $0x188] sm:$0xff]  }
  0x3e   : > { %1991 = vmatprep.subr.bf16.mxu1 %v2157_v42  ;;  %v1212_v43 = vsel %vm1046_vm1, %v1203_v38, %v2465_v39 }
  0x40   : > { %1972 = vmatpush3.bf16.msra.mxu0 %v2156_v41  ;;  %v2185_v41 = vld [vmem:[%s2558_s1 + $0x1c8] sm:$0xff]  }
  0x41   : > { %1992 = vmatpush3.bf16.msra.mxu1 %v2157_v42  ;;  %1973 = vmatprep.subr.bf16.mxu0 %v2158_v44  ;;  %v1063_v42 = vsel %vm1046_vm1, %v1054_v35, %v2462_v36 }
  0x42   : > { %1993 = vmatprep.subr.bf16.mxu1 %v2159_v45 }
  0x44   : > { %1974 = vmatpush3.bf16.msra.mxu0 %v2158_v44  ;;  %v2186_v44 = vld [vmem:[%s2558_s1 + $0x190] sm:$0xff]  }
  0x45   : > { %1994 = vmatpush3.bf16.msra.mxu1 %v2159_v45  ;;  %1999 = vmatprep.subr.bf16.mxu0 %v2161_v50  ;;  %v2187_v45 = vld [vmem:[%s2558_s1 + $0x1d0] sm:$0xff]  }
  0x46   : > { %2019 = vmatprep.subr.bf16.mxu1 %v2164_v53 }
  0x47   : > { %1976 = vmatmul.mubr.bf16.vlgmr.msra.gmra.mrb[4].mxu0 %v516_v54  ;;  %v1314_v54 = vld [vmem:[%s2309_s17] sm:$0x8] }
  0x48   : > { %2000 = vmatpush3.bf16.msra.mxu0 %v2161_v50  ;;  %1996 = vmatmul.mubr.bf16.vlgmr.msra.gmra.mrb[4].mxu1 %v2163_v52  ;;  %v2192_v50 = vld [vmem:[%s2558_s1 + $0x1a8] sm:$0xff]   ;;  %v2194_v52 = vld [vmem:[%s2558_s1 + $0x1b0] sm:$0xff]   ;;  %v1805_v57 = vcombine.low %v1314_v54, %v2426_v4  ;;  %v2209_v4 = vld [vmem:[%s2558_s1 + $0x238] sm:$0xff]  }
  0x49   : > { %2020 = vmatpush3.bf16.msra.mxu1 %v2164_v53  ;;  %2001 = vmatprep.subr.bf16.mxu0 %v2165_v55  ;;  %v2195_v53 = vld [vmem:[%s2558_s1 + $0x1f0] sm:$0xff]  }
  0x4a   : > { %2021 = vmatprep.subr.bf16.mxu1 %v2166_v58  ;;  %2015 = vmatprep.mubr.bf16.mxu0 %v2179_v59  ;;  %v1336_v59 = vrot.slane %v1805_v57, 3 }
  0x4b   : > { %2035 = vmatprep.mubr.bf16.mxu1 %v910_v60  ;;  %v1337_v60 = vrot.slane %v2436_v8, 3 }
  0x4c   : > { %2002 = vmatpush3.bf16.msra.mxu0 %v2165_v55  ;;  %v2196_v55 = vld [vmem:[%s2558_s1 + $0x1b8] sm:$0xff]  }
  0x4d   : > { %2022 = vmatpush3.bf16.msra.mxu1 %v2166_v58  ;;  %2003 = vmatprep.subr.bf16.mxu0 %v2167_v61  ;;  %v2200_v58 = vld [vmem:[%s2558_s1 + $0x200] sm:$0xff]  }
  0x4e   : > { %2023 = vmatprep.subr.bf16.mxu1 %v2168_v62 }
  0x50   : > { %2004 = vmatpush3.bf16.msra.mxu0 %v2167_v61  ;;  %v2203_v61 = vld [vmem:[%s2558_s1 + $0x208] sm:$0xff]  }
  0x51   : > { %2024 = vmatpush3.bf16.msra.mxu1 %v2168_v62  ;;  %2005 = vmatprep.subr.bf16.mxu0 %v2169_v63  ;;  %v1338_v62 = vsel %vm1335_vm2, %v1336_v59, %v1337_v60  ;;  %v1814_v59 = vld [vmem:[%s2559_s2] ss:$0 sm:$0xff] }
  0x52   : > { %2025 = vmatprep.subr.bf16.mxu1 %v2170_v0 }
  0x54   : > { %2006 = vmatpush3.bf16.msra.mxu0 %v2169_v63  ;;  %v2204_v63 = vld [vmem:[%s2558_s1 + $0x210] sm:$0xff]  }
  0x55   : > { %2026 = vmatpush3.bf16.msra.mxu1 %v2170_v0  ;;  %2007 = vmatprep.subr.bf16.mxu0 %v2171_v1  ;;  %v2205_v0 = vld [vmem:[%s2558_s1 + $0x218] sm:$0xff]  }
  0x56   : > { %2027 = vmatprep.subr.bf16.mxu1 %v2172_v2 }
  0x58   : > { %2008 = vmatpush3.bf16.msra.mxu0 %v2171_v1  ;;  %v2206_v1 = vld [vmem:[%s2558_s1 + $0x220] sm:$0xff]  }
  0x59   : > { %2028 = vmatpush3.bf16.msra.mxu1 %v2172_v2  ;;  %2009 = vmatprep.subr.bf16.mxu0 %v2173_v5  ;;  %v2207_v2 = vld [vmem:[%s2558_s1 + $0x228] sm:$0xff]  }
  0x5a   : > { %2029 = vmatprep.subr.bf16.mxu1 %v2174_v6 }
  0x5c   : > { %2010 = vmatpush3.bf16.msra.mxu0 %v2173_v5 }
  0x5d   : > { %2030 = vmatpush3.bf16.msra.mxu1 %v2174_v6  ;;  %2011 = vmatprep.subr.bf16.mxu0 %v2175_v9 }
  0x5e   : > { %2031 = vmatprep.subr.bf16.mxu1 %v2176_v12 }
  0x60   : > { %2012 = vmatpush3.bf16.msra.mxu0 %v2175_v9 }
  0x61   : > { %2032 = vmatpush3.bf16.msra.mxu1 %v2176_v12  ;;  %2013 = vmatprep.subr.bf16.mxu0 %v2177_v21 }
  0x62   : > { %2033 = vmatprep.subr.bf16.mxu1 %v2178_v22 }
  0x64   : > { %2014 = vmatpush3.bf16.msra.mxu0 %v2177_v21 }
  0x65   : > { %2034 = vmatpush3.bf16.msra.mxu1 %v2178_v22  ;;  %2039 = vmatprep.subr.bf16.mxu0 %v2181_v32 }
  0x66   : > { %2059 = vmatprep.subr.bf16.mxu1 %v2183_v33 }
  0x67   : > { %2016 = vmatmul.mubr.bf16.vlgmr.msra.gmra.mrb[8].mxu0 %v2180_v34 }
  0x68   : > { %2040 = vmatpush3.bf16.msra.mxu0 %v2181_v32  ;;  %2036 = vmatmul.mubr.bf16.vlgmr.msra.gmra.mrb[8].mxu1 %v913_v37 }
  0x69   : > { %2060 = vmatpush3.bf16.msra.mxu1 %v2183_v33  ;;  %2041 = vmatprep.subr.bf16.mxu0 %v2184_v40 }
  0x6a   : > { %2061 = vmatprep.subr.bf16.mxu1 %v2185_v41  ;;  %2055 = vmatprep.mubr.bf16.mxu0 %v1063_v42 }
  0x6b   : > { %2075 = vmatprep.mubr.bf16.mxu1 %v1212_v43 }
  0x6c   : > { %2042 = vmatpush3.bf16.msra.mxu0 %v2184_v40 }
  0x6d   : > { %2062 = vmatpush3.bf16.msra.mxu1 %v2185_v41  ;;  %2043 = vmatprep.subr.bf16.mxu0 %v2186_v44 }
  0x6e   : > { %2063 = vmatprep.subr.bf16.mxu1 %v2187_v45 }
  0x70   : > { %2044 = vmatpush3.bf16.msra.mxu0 %v2186_v44 }
  0x71   : > { %2064 = vmatpush3.bf16.msra.mxu1 %v2187_v45  ;;  %2045 = vmatprep.subr.bf16.mxu0 %v2188_v46 }
  0x72   : > { %2065 = vmatprep.subr.bf16.mxu1 %v2189_v47 }
  0x74   : > { %2046 = vmatpush3.bf16.msra.mxu0 %v2188_v46 }
  0x75   : > { %2066 = vmatpush3.bf16.msra.mxu1 %v2189_v47  ;;  %2047 = vmatprep.subr.bf16.mxu0 %v2190_v48 }
  0x76   : > { %2067 = vmatprep.subr.bf16.mxu1 %v2191_v49 }
  0x78   : > { %2048 = vmatpush3.bf16.msra.mxu0 %v2190_v48 }
  0x79   : > { %2068 = vmatpush3.bf16.msra.mxu1 %v2191_v49  ;;  %2049 = vmatprep.subr.bf16.mxu0 %v2192_v50 }
  0x7a   : > { %2069 = vmatprep.subr.bf16.mxu1 %v2193_v51 }
  0x7c   : > { %2050 = vmatpush3.bf16.msra.mxu0 %v2192_v50 }
  0x7d   : > { %2070 = vmatpush3.bf16.msra.mxu1 %v2193_v51  ;;  %2051 = vmatprep.subr.bf16.mxu0 %v2194_v52 }
  0x7e   : > { %2071 = vmatprep.subr.bf16.mxu1 %v2195_v53 }
  0x80   : > { %2052 = vmatpush3.bf16.msra.mxu0 %v2194_v52 }
  0x81   : > { %2072 = vmatpush3.bf16.msra.mxu1 %v2195_v53  ;;  %2053 = vmatprep.subr.bf16.mxu0 %v2196_v55 }
  0x82   : > { %2073 = vmatprep.subr.bf16.mxu1 %v2197_v56 }
  0x84   : > { %2054 = vmatpush3.bf16.msra.mxu0 %v2196_v55 }
  0x85   : > { %2074 = vmatpush3.bf16.msra.mxu1 %v2197_v56  ;;  %2079 = vmatprep.subr.bf16.mxu0 %v2200_v58 }
  0x87   : > { %2056 = vmatmul.mubr.bf16.vlgmr.msra.gmra.mrb[12].mxu0 %v2462_v36 }
  0x88   : > { %2080 = vmatpush3.bf16.msra.mxu0 %v2200_v58  ;;  %2076 = vmatmul.mubr.bf16.vlgmr.msra.gmra.mrb[12].mxu1 %v2465_v39 }
  0x89   : > { %2081 = vmatprep.subr.bf16.mxu0 %v2203_v61  ;;  %2095 = vmatprep.mubr.bf16.mxu0 %v1338_v62 }
  0x8c   : > { %2082 = vmatpush3.bf16.msra.mxu0 %v2203_v61 }
  0x8d   : > { %2083 = vmatprep.subr.bf16.mxu0 %v2204_v63 }
  0x90   : > { %2084 = vmatpush3.bf16.msra.mxu0 %v2204_v63 }
  0x91   : > { %2085 = vmatprep.subr.bf16.mxu0 %v2205_v0 }
  0x94   : > { %2086 = vmatpush3.bf16.msra.mxu0 %v2205_v0 }
  0x95   : > { %2087 = vmatprep.subr.bf16.mxu0 %v2206_v1 }
  0x98   : > { %2088 = vmatpush3.bf16.msra.mxu0 %v2206_v1 }
  0x99   : > { %2089 = vmatprep.subr.bf16.mxu0 %v2207_v2 }
  0x9c   : > { %2090 = vmatpush3.bf16.msra.mxu0 %v2207_v2 }
  0x9d   : > { %2091 = vmatprep.subr.bf16.mxu0 %v2208_v3 }
  0xa0   : > { %2092 = vmatpush3.bf16.msra.mxu0 %v2208_v3 }
  0xa1   : > { %2093 = vmatprep.subr.bf16.mxu0 %v2209_v4 }
  0xa4   : > { %2094 = vmatpush3.bf16.msra.mxu0 %v2209_v4 }
  0xa7   : > { %2096 = vmatmul.mubr.bf16.vlgmr.msra.gmra.mrb[16].mxu0 %v1337_v60 }
  0xfa   : > { %v1937_v5 = vpop.f32.mrb[0].mxu0 }
  0xfb   : > { %v1957_v6 = vpop.f32.mrb[0].mxu1  ;;  %v360_v7 = vpop.f32.mrb[1].mxu0 }
  0xfc   : > { %v475_v8 = vadd.f32 %v1957_v6, %v1937_v5  ;;  %v466_v9 = vpop.f32.mrb[1].mxu1  ;;  %v1938_v10 = vpop.f32.mrb[2].mxu0 }
  0xfd   : > { %v467_v11 = vadd.f32 %v466_v9, %v360_v7  ;;  %v1958_v12 = vpop.f32.mrb[2].mxu1  ;;  %v363_v13 = vpop.f32.mrb[3].mxu0 }
  0xfe   : > { %v469_v14 = vpop.f32.mrb[3].mxu1 }
  0xff   : > { %v470_v15 = vadd.f32 %v469_v14, %v363_v13 }
 0x11a   : > { %v1977_v16 = vpop.f32.mrb[4].mxu0 }
 0x11b   : > { %v617_v17 = vadd.f32 %v1977_v16, %v475_v8  ;;  %v601_v18 = vpop.f32.mrb[5].mxu0  ;;  %v1997_v19 = vpop.f32.mrb[4].mxu1 }
 0x11c   : > { %v615_v20 = vadd.f32 %v601_v18, %v467_v11  ;;  %v1978_v21 = vpop.f32.mrb[6].mxu0  ;;  %v731_v22 = vpop.f32.mrb[5].mxu1 }
 0x11d   : > { %v747_v23 = vadd.f32 %v1997_v19, %v617_v17  ;;  %v604_v24 = vpop.f32.mrb[7].mxu0  ;;  %v1998_v25 = vpop.f32.mrb[6].mxu1 }
 0x11e   : > { %v616_v26 = vadd.f32 %v604_v24, %v470_v15  ;;  %v745_v27 = vadd.f32 %v731_v22, %v615_v20  ;;  %v734_v28 = vpop.f32.mrb[7].mxu1 }
 0x120   : > { %v746_v29 = vadd.f32 %v734_v28, %v616_v26 }
 0x13a   : > { %v2017_v30 = vpop.f32.mrb[8].mxu0 }
 0x13b   : > { %v877_v31 = vadd.f32 %v2017_v30, %v747_v23  ;;  %v861_v32 = vpop.f32.mrb[9].mxu0  ;;  %v2037_v33 = vpop.f32.mrb[8].mxu1 }
 0x13c   : > { %v875_v34 = vadd.f32 %v861_v32, %v745_v27  ;;  %v2018_v35 = vpop.f32.mrb[10].mxu0  ;;  %v998_v36 = vpop.f32.mrb[9].mxu1 }
 0x13d   : > { %v1014_v37 = vadd.f32 %v2037_v33, %v877_v31  ;;  %v864_v38 = vpop.f32.mrb[11].mxu0  ;;  %v2038_v39 = vpop.f32.mrb[10].mxu1 }
 0x13e   : > { %v876_v40 = vadd.f32 %v864_v38, %v746_v29  ;;  %v1012_v41 = vadd.f32 %v998_v36, %v875_v34  ;;  %v1001_v42 = vpop.f32.mrb[11].mxu1 }
 0x140   : > { %v1013_v43 = vadd.f32 %v1001_v42, %v876_v40 }
 0x15a   : > { %v2057_v44 = vpop.f32.mrb[12].mxu0 }
 0x15b   : > { %v1164_v45 = vadd.f32 %v2057_v44, %v1014_v37  ;;  %v1148_v46 = vpop.f32.mrb[13].mxu0  ;;  %v2077_v47 = vpop.f32.mrb[12].mxu1 }
 0x15c   : > { %v1162_v48 = vadd.f32 %v1148_v46, %v1012_v41  ;;  %v2058_v49 = vpop.f32.mrb[14].mxu0  ;;  %v1297_v50 = vpop.f32.mrb[13].mxu1 }
 0x15d   : > { %v1313_v51 = vadd.f32 %v2077_v47, %v1164_v45  ;;  %v1151_v52 = vpop.f32.mrb[15].mxu0  ;;  %v2078_v53 = vpop.f32.mrb[14].mxu1 }
 0x15e   : > { %v1163_v54 = vadd.f32 %v1151_v52, %v1013_v43  ;;  %v1311_v55 = vadd.f32 %v1297_v50, %v1162_v48  ;;  %v1300_v56 = vpop.f32.mrb[15].mxu1 }
 0x160   : > { %v1312_v57 = vadd.f32 %v1300_v56, %v1163_v54 }
 0x17a   : > { %v2097_v58 = vpop.f32.mrb[16].mxu0 }
 0x17b   : > { %v1439_v60 = vadd.f32 %v2097_v58, %v1313_v51  ;;  %v1423_v61 = vpop.f32.mrb[17].mxu0 }
 0x17c   : > { %v1437_v62 = vadd.f32 %v1423_v61, %v1311_v55  ;;  %v2098_v63 = vpop.f32.mrb[18].mxu0 }
 0x17d   : > { %v1449_v0 = vadd.f32 %v1814_v59, %v1439_v60  ;;  %v1426_v1 = vpop.f32.mrb[19].mxu0 }
 0x17e   : > { %v1447_v2 = vadd.f32 %v1814_v59, %v1437_v62  ;;  %v1438_v3 = vadd.f32 %v1426_v1, %v1312_v57 }
 0x17f   : > { %v1452_v4 = vmax.f32 %v1449_v0, 0.0 }
 0x180   : > { %v1448_v5 = vadd.f32 %v1814_v59, %v1438_v3  ;;  %v1450_v7 = vmax.f32 %v1447_v2, 0.0 }
 0x181   : > { %v1823_v6 = vpack.c.bf16 %v1452_v4, %v1452_v4 }
 0x182   : > { %v1451_v8 = vmax.f32 %v1448_v5, 0.0 }
 0x183   : > { %1468 = vst [vmem:[%s226_s9 + $0x8] sm:$0x3] %v1823_v6 }
 0x184   : > { %v1827_v9 = vpack.c.bf16 %v1451_v8, %v1450_v7 }
 0x186   : > { %1828 = vst [vmem:[%s226_s9] sm:$0xff] %v1827_v9  }
 0x187 PF: > { %s13_s14 = sadd.s32 1, %s2233_s14   ;;  %s2561_s12 = smov %s2229_s13 }
 0x188   : > { %p10_p6 = scmp.ge.s32.totalorder %s13_s14, 4   ;;  %s2562_s13 = smov %s2564_s15 }
 0x18a   :  { %12 = sbr.rel (!%p10_p6) target bundleno = 2 (0x2), region = 79 }

</bundles_post_ra>
